<compile_context>
chip_gen: v7x
topology: tpu7x:2x2x1
jax: 0.10.0
libtpu: 0.0.40
codegen_flags: <defaults>
</compile_context>

<pallas_src>
import functools

import jax
import jax.numpy as jnp
import numpy as np
from jax import lax
from jax.experimental import pallas as pl
from jax.experimental.pallas import tpu as pltpu

HIGH = jax.lax.Precision.HIGHEST  # used by the pure-JAX reference only


# ---------------------------------------------------------------------------
# Fused Pallas kernel (one grid step == one sample)
# ---------------------------------------------------------------------------
def _fused_dggcn_kernel(x_ref, wdp_ref, dpsh_ref, c12w_ref, c12b_ref,
                        postw_ref, bnsh_ref, avg_ref, tile_ref, own_ref,
                        sub_ref, awide_ref, chm_ref, ab_ref,
                        o_ref, prerows_ref, *, K, mid, T, V, O, KMp):
    f32 = jnp.float32
    KM = K * mid

    alpha0 = ab_ref[0]
    beta0 = ab_ref[1]

    x_c = x_ref[0]                                                   # (C, T*V)

    # ---- down + pre 1x1 convs: one direct channel contraction --------------
    # BN scale is pre-folded into the weight rows, conv bias into the shift.
    dp = jnp.dot(wdp_ref[...], x_c, preferred_element_type=f32) + dpsh_ref[...]
    res = dp[:O, :]                                                  # (O, T*V)
    pre = jnp.maximum(dp[O:, :], 0.0)                                # (KM, T*V)

    # ---- temporal mean (host-built selector) + conv1/conv2 (merged) --------
    tmp = jnp.dot(x_c, avg_ref[...], preferred_element_type=f32)     # (C, V)
    x12 = jnp.dot(c12w_ref[...], tmp, preferred_element_type=f32) + c12b_ref[...]
    x1 = x12[:KM, :]                                                 # (KM, V)
    x2 = x12[KM:, :]                                                 # (KM, V)

    # ---- dynamic graphs for all K*mid channel blocks on one slab -----------
    dn = (((0,), (0,)), ((), ()))          # contract over the KM (row) axis
    x2t = jnp.dot(x2, tile_ref[...], preferred_element_type=f32)     # (KM, KM*V)
    x2_row = jnp.sum(x2t * own_ref[...], axis=0, keepdims=True)      # (1, KM*V)
    # ada: block-masked outer product, softmax over u (dim -2) on the slab
    s = lax.dot_general(x1, x2t * sub_ref[...], dn,
                        preferred_element_type=f32)                  # (V, KM*V)
    e = jnp.exp(s - jnp.max(s, axis=0, keepdims=True))
    ada = e * pl.reciprocal(jnp.sum(e, axis=0, keepdims=True), approx=True)
    # ctr: tanh(x1[kc, u] - x2[kc, w]) batched on the same slab
    x1e = lax.dot_general(x1, own_ref[...], dn,
                          preferred_element_type=f32)                # (V, KM*V)
    gwide = (awide_ref[...] + beta0 * ada
             + alpha0 * jnp.tanh(x1e - x2_row))                      # (V, KM*V)

    # ---- graph convolution: one batched MXU matmul --------------------------
    # Relayout (KM, T*V) -> t-major rows (T*KMp, V) via aligned slice writes.
    prerows_ref[...] = jnp.zeros_like(prerows_ref)
    for t in range(T):
        prerows_ref[t * KMp:t * KMp + KM, :] = pre[:, t * V:(t + 1) * V]
    allg = jnp.dot(prerows_ref[...], gwide,
                   preferred_element_type=f32)                       # (T*KMp, KM*V)
    chm = chm_ref[...]
    y_rows = allg[:, 0:V] * chm[:, 0:1]
    for i in range(1, KM):            # each row keeps only its own channel's graph
        y_rows = y_rows + allg[:, i * V:(i + 1) * V] * chm[:, i:i + 1]
    # Relayout back: joints return to the dense lane axis -> (KM, T*V).
    y_c = jnp.concatenate(
        [y_rows[t * KMp:t * KMp + KM, :] for t in range(T)], axis=1)

    # ---- post 1x1 conv + BN + residual + ReLU (lane-dense store) -----------
    z = jnp.dot(postw_ref[...], y_c, preferred_element_type=f32)
    z = z + bnsh_ref[...] + res
    o_ref[0] = jnp.maximum(z, 0.0).astype(o_ref.dtype)


# ---------------------------------------------------------------------------
# Host-side parameter preprocessing (done once) + wrapper
# ---------------------------------------------------------------------------
def prepare_params(p, T):
    K, mid = p["K"], p["mid"]
    KM = K * mid
    O, C = p["down_w"].shape
    V = p["A"].shape[-1]
    KMp = ((KM + 7) // 8) * 8          # 8-sublane-aligned channel blocks

    col = lambda v: jnp.asarray(v, jnp.float32).reshape(-1, 1)

    # down|pre 1x1 conv: BN scale folded into weight rows, bias into shift.
    wdp = jnp.concatenate([p["down_w"], p["pre_w"]], axis=0)          # (O+KM, C)
    scale = jnp.concatenate([p["down_scale"], p["pre_scale"]], axis=0)
    shift = jnp.concatenate(
        [p["down_b"] * p["down_scale"] + p["down_shift"],
         p["pre_b"] * p["pre_scale"] + p["pre_shift"]], axis=0)
    wdp_s = wdp * scale[:, None]
    dp_shift = col(shift)

    # conv1 / conv2 merged into one weight (no BN on these).
    c12_w = jnp.concatenate([p["c1_w"], p["c2_w"]], axis=0)           # (2KM, C)
    c12_b = col(jnp.concatenate([p["c1_b"], p["c2_b"]], axis=0))

    # post conv with the final BN folded.
    postw_s = p["post_w"] * p["bn_scale"][:, None]                    # (O, KM)
    bn_shift = col(p["post_b"] * p["bn_scale"] + p["bn_shift"])

    # ---- small host-built constants (hoisted out of the kernel) ------------
    eye_v = np.eye(V, dtype=np.float32)
    avg_sel = jnp.asarray(np.tile(eye_v, (T, 1)) / T)                 # (T*V, V)
    tile_km = jnp.asarray(np.tile(eye_v, (1, KM)))                    # (V, KM*V)
    idx = np.arange(KM)
    own = np.repeat((idx[:, None] == idx[None, :]).astype(np.float32),
                    V, axis=1)                                        # (KM, KM*V)
    sub = np.repeat((idx[:, None] // mid == idx[None, :] // mid)
                    .astype(np.float32), V, axis=1)                   # (KM, KM*V)
    a_np = np.asarray(p["A"], np.float32)                             # (K, V, V)
    a_wide = jnp.asarray(
        np.concatenate([a_np[i // mid] for i in range(KM)], axis=1))  # (V, KM*V)
    ch = np.zeros((T * KMp, KM), np.float32)                          # t-major rows
    for t in range(T):
        ch[t * KMp:t * KMp + KM, :] = np.eye(KM, dtype=np.float32)

    return dict(
        K=K, mid=mid, O=O, V=V, T=T, KMp=KMp,
        wdp_s=wdp_s, dp_shift=dp_shift, c12_w=c12_w, c12_b=c12_b,
        postw_s=postw_s, bn_shift=bn_shift,
        avg_sel=avg_sel, tile_km=tile_km,
        own=jnp.asarray(own), sub=jnp.asarray(sub),
        a_wide=a_wide, chmask=jnp.asarray(ch),
        ab=jnp.array([p["alpha0"], p["beta0"]], jnp.float32),
    )


def dggcn_forward(x, prep):
    N, C, T, V = x.shape
    K, mid, O, KMp = prep["K"], prep["mid"], prep["O"], prep["KMp"]
    KM = K * mid
    TV = T * V

    x_c = x.reshape(N, C, TV)          # metadata-only reshape (channels, T*V)

    kernel = functools.partial(_fused_dggcn_kernel,
                               K=K, mid=mid, T=T, V=V, O=O, KMp=KMp)

    def const2d(shape):
        return pl.BlockSpec(shape, lambda n: (0, 0))

    out = pl.pallas_call(
        kernel,
        out_shape=jax.ShapeDtypeStruct((N, O, TV), jnp.float32),
        grid=(N,),
        in_specs=[
            pl.BlockSpec((1, C, TV), lambda n: (n, 0, 0)),  # x (lane-dense)
            const2d((O + KM, C)),                           # down|pre weight (scaled)
            const2d((O + KM, 1)),                           # folded BN shift
            const2d((2 * KM, C)),                           # conv1|conv2 weight
            const2d((2 * KM, 1)),                           # conv1|conv2 bias
            const2d((O, KM)),                               # post weight (scaled)
            const2d((O, 1)),                                # folded final BN shift
            const2d((TV, V)),                               # temporal-mean selector
            const2d((V, KM * V)),                           # lane tiler
            const2d((KM, KM * V)),                          # own-block mask
            const2d((KM, KM * V)),                          # same-subset mask
            const2d((V, KM * V)),                           # static A, per channel blk
            const2d((T * KMp, KM)),                         # row->channel mask
            pl.BlockSpec(memory_space=pltpu.MemorySpace.SMEM),  # [alpha, beta]
        ],
        out_specs=pl.BlockSpec((1, O, TV), lambda n: (n, 0, 0)),
        scratch_shapes=[pltpu.VMEM((T * KMp, V), jnp.float32)],
        compiler_params=pltpu.CompilerParams(
            dimension_semantics=("parallel",),
            vmem_limit_bytes=32 * 1024 * 1024),
    )(x_c, prep["wdp_s"], prep["dp_shift"], prep["c12_w"], prep["c12_b"],
      prep["postw_s"], prep["bn_shift"], prep["avg_sel"], prep["tile_km"],
      prep["own"], prep["sub"], prep["a_wide"], prep["chmask"], prep["ab"])
    return out.reshape(N, O, T, V)


# ---------------------------------------------------------------------------
# Pure-JAX reference (mirrors the PyTorch forward) for verification
# ---------------------------------------------------------------------------
def ref_forward(x, p):
    relu = lambda a: jnp.maximum(a, 0.0)

    def conv(xx, w, b):
        return (jnp.einsum("oc,nctv->notv", w, xx, precision=HIGH)
                + b[None, :, None, None])

    def bn(xx, scale, shift):
        return xx * scale[None, :, None, None] + shift[None, :, None, None]

    N, C, T, V = x.shape
    K, mid = p["K"], p["mid"]
    res = bn(conv(x, p["down_w"], p["down_b"]), p["down_scale"], p["down_shift"])
    pre = relu(bn(conv(x, p["pre_w"], p["pre_b"]), p["pre_scale"], p["pre_shift"]))
    pre_x = pre.reshape(N, K, mid, T, V)
    tmp = x.mean(axis=2, keepdims=True)
    x1 = conv(tmp, p["c1_w"], p["c1_b"]).reshape(N, K, mid, V)
    x2 = conv(tmp, p["c2_w"], p["c2_b"]).reshape(N, K, mid, V)
    ctr = jnp.tanh(x1[..., :, None] - x2[..., None, :]) * p["alpha0"]
    s = jnp.einsum("nkcu,nkcw->nkuw", x1, x2, precision=HIGH)
    ada = jax.nn.softmax(s, axis=-2) * p["beta0"]
    A_full = ctr + ada[:, :, None] + p["A"][None, :, None]
    y = jnp.einsum("nkctv,nkcvw->nkctw", pre_x, A_full, precision=HIGH)
    y = y.reshape(N, K * mid, T, V)
    return relu(bn(conv(y, p["post_w"], p["post_b"]),
                   p["bn_scale"], p["bn_shift"]) + res)


# ---------------------------------------------------------------------------
if __name__ == "__main__":
    N, C_in, C_out, K, T, V = 2, 4, 8, 3, 8, 16
    mid = int(0.25 * C_out)  # ratio = 0.25 -> mid_channels = 2

    key = jax.random.PRNGKey(0)
    keys = iter(jax.random.split(key, 32))
    nk = lambda: next(keys)
    nrm = lambda k, shape, s=0.2: s * jax.random.normal(k, shape, jnp.float32)

    def bn_fold(c):
        gamma = 1.0 + 0.05 * jax.random.normal(nk(), (c,), jnp.float32)
        beta = 0.05 * jax.random.normal(nk(), (c,), jnp.float32)
        mean = 0.05 * jax.random.normal(nk(), (c,), jnp.float32)
        var = 0.5 + jnp.abs(0.1 * jax.random.normal(nk(), (c,), jnp.float32))
        scale = gamma / jnp.sqrt(var + 1e-5)
        shift = beta - mean * scale
        return scale, shift

    x = jax.random.normal(nk(), (N, C_in, T, V), jnp.float32)

    p = {"K": K, "mid": mid}
    p["A"] = 0.2 * jax.random.normal(nk(), (K, V, V), jnp.float32)
    p["pre_w"] = nrm(nk(), (K * mid, C_in)); p["pre_b"] = nrm(nk(), (K * mid,), 0.1)
    p["pre_scale"], p["pre_shift"] = bn_fold(K * mid)
    p["c1_w"] = nrm(nk(), (K * mid, C_in)); p["c1_b"] = nrm(nk(), (K * mid,), 0.1)
    p["c2_w"] = nrm(nk(), (K * mid, C_in)); p["c2_b"] = nrm(nk(), (K * mid,), 0.1)
    p["post_w"] = nrm(nk(), (C_out, K * mid)); p["post_b"] = nrm(nk(), (C_out,), 0.1)
    p["down_w"] = nrm(nk(), (C_out, C_in)); p["down_b"] = nrm(nk(), (C_out,), 0.1)
    p["down_scale"], p["down_shift"] = bn_fold(C_out)
    p["bn_scale"], p["bn_shift"] = bn_fold(C_out)
    # nn.Parameter alpha/beta init to zeros in the module; use nonzero synthetic
    # values so the ctr (tanh-diff) and ada (softmax outer-product) paths are live.
    p["alpha0"] = 0.5
    p["beta0"] = 0.25

    prep = prepare_params(p, T)
    out = jax.block_until_ready(dggcn_forward(x, prep))
    ref = jax.block_until_ready(ref_forward(x, p))
    np.testing.assert_allclose(np.asarray(out), np.asarray(ref),
                               rtol=2e-2, atol=2e-2)
    print("KERNEL_OK")
</pallas_src>

<mosaic_0001>
module attributes {stable_mosaic.version = 11 : i64} {
  func.func @_fused_dggcn_kernel(%arg0: i32, %arg1: memref<1x4x128xf32, #tpu.memory_space<vmem>>, %arg2: memref<14x4xf32, #tpu.memory_space<vmem>>, %arg3: memref<14x1xf32, #tpu.memory_space<vmem>>, %arg4: memref<12x4xf32, #tpu.memory_space<vmem>>, %arg5: memref<12x1xf32, #tpu.memory_space<vmem>>, %arg6: memref<8x6xf32, #tpu.memory_space<vmem>>, %arg7: memref<8x1xf32, #tpu.memory_space<vmem>>, %arg8: memref<128x16xf32, #tpu.memory_space<vmem>>, %arg9: memref<16x96xf32, #tpu.memory_space<vmem>>, %arg10: memref<6x96xf32, #tpu.memory_space<vmem>>, %arg11: memref<6x96xf32, #tpu.memory_space<vmem>>, %arg12: memref<16x96xf32, #tpu.memory_space<vmem>>, %arg13: memref<64x6xf32, #tpu.memory_space<vmem>>, %arg14: memref<2xf32, #tpu.memory_space<smem>>, %arg15: memref<1x8x128xf32, #tpu.memory_space<vmem>>, %arg16: memref<64x16xf32, #tpu.memory_space<vmem>>) attributes {dimension_semantics = [#tpu.dimension_semantics<parallel>], iteration_bounds = array<i64: 2>, scalar_prefetch = 0 : i64, scratch_operands = 1 : i64, tpu.core_type = #tpu.core_type<tc>, window_params = [{transform_indices = @transform_0, window_bounds = array<i64: 1, 4, 128>}, {pipeline_mode = #tpu.pipeline_mode<synchronous>, transform_indices = @transform_1, window_bounds = array<i64: 14, 4>}, {pipeline_mode = #tpu.pipeline_mode<synchronous>, transform_indices = @transform_2, window_bounds = array<i64: 14, 1>}, {pipeline_mode = #tpu.pipeline_mode<synchronous>, transform_indices = @transform_3, window_bounds = array<i64: 12, 4>}, {pipeline_mode = #tpu.pipeline_mode<synchronous>, transform_indices = @transform_4, window_bounds = array<i64: 12, 1>}, {pipeline_mode = #tpu.pipeline_mode<synchronous>, transform_indices = @transform_5, window_bounds = array<i64: 8, 6>}, {pipeline_mode = #tpu.pipeline_mode<synchronous>, transform_indices = @transform_6, window_bounds = array<i64: 8, 1>}, {pipeline_mode = #tpu.pipeline_mode<synchronous>, transform_indices = @transform_7, window_bounds = array<i64: 128, 16>}, {pipeline_mode = #tpu.pipeline_mode<synchronous>, transform_indices = @transform_8, window_bounds = array<i64: 16, 96>}, {pipeline_mode = #tpu.pipeline_mode<synchronous>, transform_indices = @transform_9, window_bounds = array<i64: 6, 96>}, {pipeline_mode = #tpu.pipeline_mode<synchronous>, transform_indices = @transform_10, window_bounds = array<i64: 6, 96>}, {pipeline_mode = #tpu.pipeline_mode<synchronous>, transform_indices = @transform_11, window_bounds = array<i64: 16, 96>}, {pipeline_mode = #tpu.pipeline_mode<synchronous>, transform_indices = @transform_12, window_bounds = array<i64: 64, 6>}, {transform_indices = @transform_13, window_bounds = array<i64: 2>}, {transform_indices = @transform_14, window_bounds = array<i64: 1, 8, 128>}]} {
    %c0 = arith.constant 0 : index
    %0 = memref.load %arg14[%c0] : memref<2xf32, #tpu.memory_space<smem>>
    %c1 = arith.constant 1 : index
    %1 = memref.load %arg14[%c1] : memref<2xf32, #tpu.memory_space<smem>>
    %c0_0 = arith.constant 0 : index
    %c0_1 = arith.constant 0 : index
    %c0_2 = arith.constant 0 : index
    %2 = vector.load %arg1[%c0_0, %c0_1, %c0_2] : memref<1x4x128xf32, #tpu.memory_space<vmem>>, vector<1x4x128xf32>
    %3 = vector.shape_cast %2 : vector<1x4x128xf32> to vector<4x128xf32>
    %c0_3 = arith.constant 0 : index
    %c0_4 = arith.constant 0 : index
    %4 = vector.load %arg2[%c0_3, %c0_4] : memref<14x4xf32, #tpu.memory_space<vmem>>, vector<14x4xf32>
    %cst = arith.constant dense<0.000000e+00> : vector<14x128xf32>
    %5 = tpu.matmul %4, %3, %cst {dimension_numbers = #tpu.dot_dimension_numbers<[1], [0], [0], [1], [0, 0, 1, 1], [], []>} : vector<14x4xf32>, vector<4x128xf32>, vector<14x128xf32> -> vector<14x128xf32>
    %c0_5 = arith.constant 0 : index
    %c0_6 = arith.constant 0 : index
    %6 = vector.load %arg3[%c0_5, %c0_6] : memref<14x1xf32, #tpu.memory_space<vmem>>, vector<14x1xf32>
    %7 = vector.broadcast %6 : vector<14x1xf32> to vector<14x128xf32>
    %8 = arith.addf %5, %7 : vector<14x128xf32>
    %9 = vector.extract_strided_slice %8 {offsets = [0, 0], sizes = [8, 128], strides = [1, 1]} : vector<14x128xf32> to vector<8x128xf32>
    %10 = vector.extract_strided_slice %8 {offsets = [8, 0], sizes = [6, 128], strides = [1, 1]} : vector<14x128xf32> to vector<6x128xf32>
    %cst_7 = arith.constant 0.000000e+00 : f32
    %11 = vector.broadcast %cst_7 : f32 to vector<6x128xf32>
    %12 = arith.maximumf %10, %11 : vector<6x128xf32>
    %c0_8 = arith.constant 0 : index
    %c0_9 = arith.constant 0 : index
    %13 = vector.load %arg8[%c0_8, %c0_9] : memref<128x16xf32, #tpu.memory_space<vmem>>, vector<128x16xf32>
    %cst_10 = arith.constant dense<0.000000e+00> : vector<4x16xf32>
    %14 = tpu.matmul %3, %13, %cst_10 {dimension_numbers = #tpu.dot_dimension_numbers<[1], [0], [0], [1], [0, 0, 1, 1], [], []>} : vector<4x128xf32>, vector<128x16xf32>, vector<4x16xf32> -> vector<4x16xf32>
    %c0_11 = arith.constant 0 : index
    %c0_12 = arith.constant 0 : index
    %15 = vector.load %arg4[%c0_11, %c0_12] : memref<12x4xf32, #tpu.memory_space<vmem>>, vector<12x4xf32>
    %cst_13 = arith.constant dense<0.000000e+00> : vector<12x16xf32>
    %16 = tpu.matmul %15, %14, %cst_13 {dimension_numbers = #tpu.dot_dimension_numbers<[1], [0], [0], [1], [0, 0, 1, 1], [], []>} : vector<12x4xf32>, vector<4x16xf32>, vector<12x16xf32> -> vector<12x16xf32>
    %c0_14 = arith.constant 0 : index
    %c0_15 = arith.constant 0 : index
    %17 = vector.load %arg5[%c0_14, %c0_15] : memref<12x1xf32, #tpu.memory_space<vmem>>, vector<12x1xf32>
    %18 = vector.broadcast %17 : vector<12x1xf32> to vector<12x16xf32>
    %19 = arith.addf %16, %18 : vector<12x16xf32>
    %20 = vector.extract_strided_slice %19 {offsets = [0, 0], sizes = [6, 16], strides = [1, 1]} : vector<12x16xf32> to vector<6x16xf32>
    %21 = vector.extract_strided_slice %19 {offsets = [6, 0], sizes = [6, 16], strides = [1, 1]} : vector<12x16xf32> to vector<6x16xf32>
    %c0_16 = arith.constant 0 : index
    %c0_17 = arith.constant 0 : index
    %22 = vector.load %arg9[%c0_16, %c0_17] : memref<16x96xf32, #tpu.memory_space<vmem>>, vector<16x96xf32>
    %cst_18 = arith.constant dense<0.000000e+00> : vector<6x96xf32>
    %23 = tpu.matmul %21, %22, %cst_18 {dimension_numbers = #tpu.dot_dimension_numbers<[1], [0], [0], [1], [0, 0, 1, 1], [], []>} : vector<6x16xf32>, vector<16x96xf32>, vector<6x96xf32> -> vector<6x96xf32>
    %c0_19 = arith.constant 0 : index
    %c0_20 = arith.constant 0 : index
    %24 = vector.load %arg10[%c0_19, %c0_20] : memref<6x96xf32, #tpu.memory_space<vmem>>, vector<6x96xf32>
    %25 = arith.mulf %23, %24 : vector<6x96xf32>
    %cst_21 = arith.constant dense<0.000000e+00> : vector<96xf32>
    %26 = vector.multi_reduction <add>, %25, %cst_21 [0] : vector<6x96xf32> to vector<96xf32>
    %27 = vector.shape_cast %26 : vector<96xf32> to vector<1x96xf32>
    %c0_22 = arith.constant 0 : index
    %c0_23 = arith.constant 0 : index
    %28 = vector.load %arg11[%c0_22, %c0_23] : memref<6x96xf32, #tpu.memory_space<vmem>>, vector<6x96xf32>
    %29 = arith.mulf %23, %28 : vector<6x96xf32>
    %cst_24 = arith.constant dense<0.000000e+00> : vector<16x96xf32>
    %30 = tpu.matmul %20, %29, %cst_24 {dimension_numbers = #tpu.dot_dimension_numbers<[0], [0], [1], [1], [0, 1, 1, 1], [], []>} : vector<6x16xf32>, vector<6x96xf32>, vector<16x96xf32> -> vector<16x96xf32>
    %cst_25 = arith.constant dense<0xFF800000> : vector<96xf32>
    %31 = vector.multi_reduction <maximumf>, %30, %cst_25 [0] : vector<16x96xf32> to vector<96xf32>
    %32 = vector.shape_cast %31 : vector<96xf32> to vector<1x96xf32>
    %33 = vector.broadcast %32 : vector<1x96xf32> to vector<16x96xf32>
    %34 = arith.subf %30, %33 : vector<16x96xf32>
    %35 = math.exp %34 : vector<16x96xf32>
    %cst_26 = arith.constant dense<0.000000e+00> : vector<96xf32>
    %36 = vector.multi_reduction <add>, %35, %cst_26 [0] : vector<16x96xf32> to vector<96xf32>
    %37 = vector.shape_cast %36 : vector<96xf32> to vector<1x96xf32>
    %38 = tpu.reciprocal %37 {approx = true} : vector<1x96xf32> -> vector<1x96xf32>
    %39 = vector.broadcast %38 : vector<1x96xf32> to vector<16x96xf32>
    %40 = arith.mulf %35, %39 : vector<16x96xf32>
    %c0_27 = arith.constant 0 : index
    %c0_28 = arith.constant 0 : index
    %41 = vector.load %arg10[%c0_27, %c0_28] : memref<6x96xf32, #tpu.memory_space<vmem>>, vector<6x96xf32>
    %cst_29 = arith.constant dense<0.000000e+00> : vector<16x96xf32>
    %42 = tpu.matmul %20, %41, %cst_29 {dimension_numbers = #tpu.dot_dimension_numbers<[0], [0], [1], [1], [0, 1, 1, 1], [], []>} : vector<6x16xf32>, vector<6x96xf32>, vector<16x96xf32> -> vector<16x96xf32>
    %c0_30 = arith.constant 0 : index
    %c0_31 = arith.constant 0 : index
    %43 = vector.load %arg12[%c0_30, %c0_31] : memref<16x96xf32, #tpu.memory_space<vmem>>, vector<16x96xf32>
    %44 = vector.broadcast %1 : f32 to vector<16x96xf32>
    %45 = arith.mulf %44, %40 : vector<16x96xf32>
    %46 = arith.addf %43, %45 : vector<16x96xf32>
    %47 = vector.broadcast %27 : vector<1x96xf32> to vector<16x96xf32>
    %48 = arith.subf %42, %47 : vector<16x96xf32>
    %49 = math.tanh %48 : vector<16x96xf32>
    %50 = vector.broadcast %0 : f32 to vector<16x96xf32>
    %51 = arith.mulf %50, %49 : vector<16x96xf32>
    %52 = arith.addf %46, %51 : vector<16x96xf32>
    %cst_32 = arith.constant 0.000000e+00 : f32
    %53 = vector.broadcast %cst_32 : f32 to vector<64x16xf32>
    %c0_33 = arith.constant 0 : index
    %c0_34 = arith.constant 0 : index
    %54 = vector.load %arg16[%c0_33, %c0_34] : memref<64x16xf32, #tpu.memory_space<vmem>>, vector<64x16xf32>
    tpu.vector_store %arg16[%c0_33, %c0_34], %53 {strides = array<i32>} : memref<64x16xf32, #tpu.memory_space<vmem>>, vector<64x16xf32>,
    %55 = vector.extract_strided_slice %12 {offsets = [0, 0], sizes = [6, 16], strides = [1, 1]} : vector<6x128xf32> to vector<6x16xf32>
    %c0_35 = arith.constant 0 : index
    %c0_36 = arith.constant 0 : index
    %56 = vector.load %arg16[%c0_35, %c0_36] : memref<64x16xf32, #tpu.memory_space<vmem>>, vector<6x16xf32>
    tpu.vector_store %arg16[%c0_35, %c0_36], %55 {strides = array<i32>} : memref<64x16xf32, #tpu.memory_space<vmem>>, vector<6x16xf32>,
    %57 = vector.extract_strided_slice %12 {offsets = [0, 16], sizes = [6, 16], strides = [1, 1]} : vector<6x128xf32> to vector<6x16xf32>
    %c8 = arith.constant 8 : index
    %c0_37 = arith.constant 0 : index
    %58 = vector.load %arg16[%c8, %c0_37] : memref<64x16xf32, #tpu.memory_space<vmem>>, vector<6x16xf32>
    tpu.vector_store %arg16[%c8, %c0_37], %57 {strides = array<i32>} : memref<64x16xf32, #tpu.memory_space<vmem>>, vector<6x16xf32>,
    %59 = vector.extract_strided_slice %12 {offsets = [0, 32], sizes = [6, 16], strides = [1, 1]} : vector<6x128xf32> to vector<6x16xf32>
    %c16 = arith.constant 16 : index
    %c0_38 = arith.constant 0 : index
    %60 = vector.load %arg16[%c16, %c0_38] : memref<64x16xf32, #tpu.memory_space<vmem>>, vector<6x16xf32>
    tpu.vector_store %arg16[%c16, %c0_38], %59 {strides = array<i32>} : memref<64x16xf32, #tpu.memory_space<vmem>>, vector<6x16xf32>,
    %61 = vector.extract_strided_slice %12 {offsets = [0, 48], sizes = [6, 16], strides = [1, 1]} : vector<6x128xf32> to vector<6x16xf32>
    %c24 = arith.constant 24 : index
    %c0_39 = arith.constant 0 : index
    %62 = vector.load %arg16[%c24, %c0_39] : memref<64x16xf32, #tpu.memory_space<vmem>>, vector<6x16xf32>
    tpu.vector_store %arg16[%c24, %c0_39], %61 {strides = array<i32>} : memref<64x16xf32, #tpu.memory_space<vmem>>, vector<6x16xf32>,
    %63 = vector.extract_strided_slice %12 {offsets = [0, 64], sizes = [6, 16], strides = [1, 1]} : vector<6x128xf32> to vector<6x16xf32>
    %c32 = arith.constant 32 : index
    %c0_40 = arith.constant 0 : index
    %64 = vector.load %arg16[%c32, %c0_40] : memref<64x16xf32, #tpu.memory_space<vmem>>, vector<6x16xf32>
    tpu.vector_store %arg16[%c32, %c0_40], %63 {strides = array<i32>} : memref<64x16xf32, #tpu.memory_space<vmem>>, vector<6x16xf32>,
    %65 = vector.extract_strided_slice %12 {offsets = [0, 80], sizes = [6, 16], strides = [1, 1]} : vector<6x128xf32> to vector<6x16xf32>
    %c40 = arith.constant 40 : index
    %c0_41 = arith.constant 0 : index
    %66 = vector.load %arg16[%c40, %c0_41] : memref<64x16xf32, #tpu.memory_space<vmem>>, vector<6x16xf32>
    tpu.vector_store %arg16[%c40, %c0_41], %65 {strides = array<i32>} : memref<64x16xf32, #tpu.memory_space<vmem>>, vector<6x16xf32>,
    %67 = vector.extract_strided_slice %12 {offsets = [0, 96], sizes = [6, 16], strides = [1, 1]} : vector<6x128xf32> to vector<6x16xf32>
    %c48 = arith.constant 48 : index
    %c0_42 = arith.constant 0 : index
    %68 = vector.load %arg16[%c48, %c0_42] : memref<64x16xf32, #tpu.memory_space<vmem>>, vector<6x16xf32>
    tpu.vector_store %arg16[%c48, %c0_42], %67 {strides = array<i32>} : memref<64x16xf32, #tpu.memory_space<vmem>>, vector<6x16xf32>,
    %69 = vector.extract_strided_slice %12 {offsets = [0, 112], sizes = [6, 16], strides = [1, 1]} : vector<6x128xf32> to vector<6x16xf32>
    %c56 = arith.constant 56 : index
    %c0_43 = arith.constant 0 : index
    %70 = vector.load %arg16[%c56, %c0_43] : memref<64x16xf32, #tpu.memory_space<vmem>>, vector<6x16xf32>
    tpu.vector_store %arg16[%c56, %c0_43], %69 {strides = array<i32>} : memref<64x16xf32, #tpu.memory_space<vmem>>, vector<6x16xf32>,
    %c0_44 = arith.constant 0 : index
    %c0_45 = arith.constant 0 : index
    %71 = vector.load %arg16[%c0_44, %c0_45] : memref<64x16xf32, #tpu.memory_space<vmem>>, vector<64x16xf32>
    %cst_46 = arith.constant dense<0.000000e+00> : vector<64x96xf32>
    %72 = tpu.matmul %71, %52, %cst_46 {dimension_numbers = #tpu.dot_dimension_numbers<[1], [0], [0], [1], [0, 0, 1, 1], [], []>} : vector<64x16xf32>, vector<16x96xf32>, vector<64x96xf32> -> vector<64x96xf32>
    %c0_47 = arith.constant 0 : index
    %c0_48 = arith.constant 0 : index
    %73 = vector.load %arg13[%c0_47, %c0_48] : memref<64x6xf32, #tpu.memory_space<vmem>>, vector<64x6xf32>
    %74 = vector.extract_strided_slice %72 {offsets = [0, 0], sizes = [64, 16], strides = [1, 1]} : vector<64x96xf32> to vector<64x16xf32>
    %75 = vector.extract_strided_slice %73 {offsets = [0, 0], sizes = [64, 1], strides = [1, 1]} : vector<64x6xf32> to vector<64x1xf32>
    %76 = vector.broadcast %75 : vector<64x1xf32> to vector<64x16xf32>
    %77 = arith.mulf %74, %76 : vector<64x16xf32>
    %78 = vector.extract_strided_slice %72 {offsets = [0, 16], sizes = [64, 16], strides = [1, 1]} : vector<64x96xf32> to vector<64x16xf32>
    %79 = vector.extract_strided_slice %73 {offsets = [0, 1], sizes = [64, 1], strides = [1, 1]} : vector<64x6xf32> to vector<64x1xf32>
    %80 = vector.broadcast %79 : vector<64x1xf32> to vector<64x16xf32>
    %81 = arith.mulf %78, %80 : vector<64x16xf32>
    %82 = arith.addf %77, %81 : vector<64x16xf32>
    %83 = vector.extract_strided_slice %72 {offsets = [0, 32], sizes = [64, 16], strides = [1, 1]} : vector<64x96xf32> to vector<64x16xf32>
    %84 = vector.extract_strided_slice %73 {offsets = [0, 2], sizes = [64, 1], strides = [1, 1]} : vector<64x6xf32> to vector<64x1xf32>
    %85 = vector.broadcast %84 : vector<64x1xf32> to vector<64x16xf32>
    %86 = arith.mulf %83, %85 : vector<64x16xf32>
    %87 = arith.addf %82, %86 : vector<64x16xf32>
    %88 = vector.extract_strided_slice %72 {offsets = [0, 48], sizes = [64, 16], strides = [1, 1]} : vector<64x96xf32> to vector<64x16xf32>
    %89 = vector.extract_strided_slice %73 {offsets = [0, 3], sizes = [64, 1], strides = [1, 1]} : vector<64x6xf32> to vector<64x1xf32>
    %90 = vector.broadcast %89 : vector<64x1xf32> to vector<64x16xf32>
    %91 = arith.mulf %88, %90 : vector<64x16xf32>
    %92 = arith.addf %87, %91 : vector<64x16xf32>
    %93 = vector.extract_strided_slice %72 {offsets = [0, 64], sizes = [64, 16], strides = [1, 1]} : vector<64x96xf32> to vector<64x16xf32>
    %94 = vector.extract_strided_slice %73 {offsets = [0, 4], sizes = [64, 1], strides = [1, 1]} : vector<64x6xf32> to vector<64x1xf32>
    %95 = vector.broadcast %94 : vector<64x1xf32> to vector<64x16xf32>
    %96 = arith.mulf %93, %95 : vector<64x16xf32>
    %97 = arith.addf %92, %96 : vector<64x16xf32>
    %98 = vector.extract_strided_slice %72 {offsets = [0, 80], sizes = [64, 16], strides = [1, 1]} : vector<64x96xf32> to vector<64x16xf32>
    %99 = vector.extract_strided_slice %73 {offsets = [0, 5], sizes = [64, 1], strides = [1, 1]} : vector<64x6xf32> to vector<64x1xf32>
    %100 = vector.broadcast %99 : vector<64x1xf32> to vector<64x16xf32>
    %101 = arith.mulf %98, %100 : vector<64x16xf32>
    %102 = arith.addf %97, %101 : vector<64x16xf32>
    %103 = vector.extract_strided_slice %102 {offsets = [0, 0], sizes = [6, 16], strides = [1, 1]} : vector<64x16xf32> to vector<6x16xf32>
    %104 = vector.extract_strided_slice %102 {offsets = [8, 0], sizes = [6, 16], strides = [1, 1]} : vector<64x16xf32> to vector<6x16xf32>
    %105 = vector.extract_strided_slice %102 {offsets = [16, 0], sizes = [6, 16], strides = [1, 1]} : vector<64x16xf32> to vector<6x16xf32>
    %106 = vector.extract_strided_slice %102 {offsets = [24, 0], sizes = [6, 16], strides = [1, 1]} : vector<64x16xf32> to vector<6x16xf32>
    %107 = vector.extract_strided_slice %102 {offsets = [32, 0], sizes = [6, 16], strides = [1, 1]} : vector<64x16xf32> to vector<6x16xf32>
    %108 = vector.extract_strided_slice %102 {offsets = [40, 0], sizes = [6, 16], strides = [1, 1]} : vector<64x16xf32> to vector<6x16xf32>
    %109 = vector.extract_strided_slice %102 {offsets = [48, 0], sizes = [6, 16], strides = [1, 1]} : vector<64x16xf32> to vector<6x16xf32>
    %110 = vector.extract_strided_slice %102 {offsets = [56, 0], sizes = [6, 16], strides = [1, 1]} : vector<64x16xf32> to vector<6x16xf32>
    %111 = tpu.concatenate %103, %104, %105, %106, %107, %108, %109, %110 in 1 : vector<6x16xf32>, vector<6x16xf32>, vector<6x16xf32>, vector<6x16xf32>, vector<6x16xf32>, vector<6x16xf32>, vector<6x16xf32>, vector<6x16xf32> -> vector<6x128xf32>
    %c0_49 = arith.constant 0 : index
    %c0_50 = arith.constant 0 : index
    %112 = vector.load %arg6[%c0_49, %c0_50] : memref<8x6xf32, #tpu.memory_space<vmem>>, vector<8x6xf32>
    %cst_51 = arith.constant dense<0.000000e+00> : vector<8x128xf32>
    %113 = tpu.matmul %112, %111, %cst_51 {dimension_numbers = #tpu.dot_dimension_numbers<[1], [0], [0], [1], [0, 0, 1, 1], [], []>} : vector<8x6xf32>, vector<6x128xf32>, vector<8x128xf32> -> vector<8x128xf32>
    %c0_52 = arith.constant 0 : index
    %c0_53 = arith.constant 0 : index
    %114 = vector.load %arg7[%c0_52, %c0_53] : memref<8x1xf32, #tpu.memory_space<vmem>>, vector<8x1xf32>
    %115 = vector.broadcast %114 : vector<8x1xf32> to vector<8x128xf32>
    %116 = arith.addf %113, %115 : vector<8x128xf32>
    %117 = arith.addf %116, %9 : vector<8x128xf32>
    %cst_54 = arith.constant 0.000000e+00 : f32
    %118 = vector.broadcast %cst_54 : f32 to vector<8x128xf32>
    %119 = arith.maximumf %117, %118 : vector<8x128xf32>
    %c0_55 = arith.constant 0 : index
    %c0_56 = arith.constant 0 : index
    %c0_57 = arith.constant 0 : index
    %120 = vector.load %arg15[%c0_55, %c0_56, %c0_57] : memref<1x8x128xf32, #tpu.memory_space<vmem>>, vector<1x8x128xf32>
    %121 = vector.shape_cast %120 : vector<1x8x128xf32> to vector<8x128xf32>
    %122 = vector.shape_cast %119 : vector<8x128xf32> to vector<1x8x128xf32>
    tpu.vector_store %arg15[%c0_55, %c0_56, %c0_57], %122 {strides = array<i32>} : memref<1x8x128xf32, #tpu.memory_space<vmem>>, vector<1x8x128xf32>,
    return
  }
  func.func @transform_0(%arg0: i32) -> (i32, i32, i32) {
    %c0_i32 = arith.constant 0 : i32
    %c0_i32_0 = arith.constant 0 : i32
    %c0_i32_1 = arith.constant 0 : i32
    return %arg0, %c0_i32, %c0_i32_0 : i32, i32, i32
  }
  func.func @transform_1(%arg0: i32) -> (i32, i32) {
    %c0_i32 = arith.constant 0 : i32
    %c0_i32_0 = arith.constant 0 : i32
    %c0_i32_1 = arith.constant 0 : i32
    return %c0_i32, %c0_i32_0 : i32, i32
  }
  func.func @transform_2(%arg0: i32) -> (i32, i32) {
    %c0_i32 = arith.constant 0 : i32
    %c0_i32_0 = arith.constant 0 : i32
    %c0_i32_1 = arith.constant 0 : i32
    return %c0_i32, %c0_i32_0 : i32, i32
  }
  func.func @transform_3(%arg0: i32) -> (i32, i32) {
    %c0_i32 = arith.constant 0 : i32
    %c0_i32_0 = arith.constant 0 : i32
    %c0_i32_1 = arith.constant 0 : i32
    return %c0_i32, %c0_i32_0 : i32, i32
  }
  func.func @transform_4(%arg0: i32) -> (i32, i32) {
    %c0_i32 = arith.constant 0 : i32
    %c0_i32_0 = arith.constant 0 : i32
    %c0_i32_1 = arith.constant 0 : i32
    return %c0_i32, %c0_i32_0 : i32, i32
  }
  func.func @transform_5(%arg0: i32) -> (i32, i32) {
    %c0_i32 = arith.constant 0 : i32
    %c0_i32_0 = arith.constant 0 : i32
    %c0_i32_1 = arith.constant 0 : i32
    return %c0_i32, %c0_i32_0 : i32, i32
  }
  func.func @transform_6(%arg0: i32) -> (i32, i32) {
    %c0_i32 = arith.constant 0 : i32
    %c0_i32_0 = arith.constant 0 : i32
    %c0_i32_1 = arith.constant 0 : i32
    return %c0_i32, %c0_i32_0 : i32, i32
  }
  func.func @transform_7(%arg0: i32) -> (i32, i32) {
    %c0_i32 = arith.constant 0 : i32
    %c0_i32_0 = arith.constant 0 : i32
    %c0_i32_1 = arith.constant 0 : i32
    return %c0_i32, %c0_i32_0 : i32, i32
  }
  func.func @transform_8(%arg0: i32) -> (i32, i32) {
    %c0_i32 = arith.constant 0 : i32
    %c0_i32_0 = arith.constant 0 : i32
    %c0_i32_1 = arith.constant 0 : i32
    return %c0_i32, %c0_i32_0 : i32, i32
  }
  func.func @transform_9(%arg0: i32) -> (i32, i32) {
    %c0_i32 = arith.constant 0 : i32
    %c0_i32_0 = arith.constant 0 : i32
    %c0_i32_1 = arith.constant 0 : i32
    return %c0_i32, %c0_i32_0 : i32, i32
  }
  func.func @transform_10(%arg0: i32) -> (i32, i32) {
    %c0_i32 = arith.constant 0 : i32
    %c0_i32_0 = arith.constant 0 : i32
    %c0_i32_1 = arith.constant 0 : i32
    return %c0_i32, %c0_i32_0 : i32, i32
  }
  func.func @transform_11(%arg0: i32) -> (i32, i32) {
    %c0_i32 = arith.constant 0 : i32
    %c0_i32_0 = arith.constant 0 : i32
    %c0_i32_1 = arith.constant 0 : i32
    return %c0_i32, %c0_i32_0 : i32, i32
  }
  func.func @transform_12(%arg0: i32) -> (i32, i32) {
    %c0_i32 = arith.constant 0 : i32
    %c0_i32_0 = arith.constant 0 : i32
    %c0_i32_1 = arith.constant 0 : i32
    return %c0_i32, %c0_i32_0 : i32, i32
  }
  func.func @transform_13(%arg0: i32) -> i32 {
    %c0_i32 = arith.constant 0 : i32
    %c0_i32_0 = arith.constant 0 : i32
    return %c0_i32 : i32
  }
  func.func @transform_14(%arg0: i32) -> (i32, i32, i32) {
    %c0_i32 = arith.constant 0 : i32
    %c0_i32_0 = arith.constant 0 : i32
    %c0_i32_1 = arith.constant 0 : i32
    return %arg0, %c0_i32, %c0_i32_0 : i32, i32, i32
  }
}

</mosaic_0001>

<bundles_post_ra>
// kernel: tpu_custom_call.1
= control target key start
LH: loop header
LB: loop body
LE: loop exit
PB: predicated region body
PF: predicated region fallthrough
CT: control target
= control target key end

     0   :  { %s2986_s0 = inlined_call_operand.vmem [shape: f32[2,4,128], index: 0, kind: input, shape index: {}]   ;;  %s2987_s1 = inlined_call_operand.vmem [shape: f32[14,4], index: 1, kind: input, shape index: {}]   ;;  %s2988_s2 = inlined_call_operand.vmem [shape: f32[14,1], index: 2, kind: input, shape index: {}]   ;;  %s2989_s3 = inlined_call_operand.vmem [shape: f32[12,4], index: 3, kind: input, shape index: {}]   ;;  %s2990_s4 = inlined_call_operand.vmem [shape: f32[12,1], index: 4, kind: input, shape index: {}]   ;;  %s2991_s5 = inlined_call_operand.vmem [shape: f32[8,6], index: 5, kind: input, shape index: {}]   ;;  %s2992_s6 = inlined_call_operand.vmem [shape: f32[8,1], index: 6, kind: input, shape index: {}]   ;;  %s2993_s7 = inlined_call_operand.vmem [shape: f32[128,16], index: 7, kind: input, shape index: {}]   ;;  %s2994_s8 = inlined_call_operand.vmem [shape: f32[16,96], index: 8, kind: input, shape index: {}]   ;;  %s2995_s9 = inlined_call_operand.vmem [shape: f32[6,96], index: 9, kind: input, shape index: {}]   ;;  %s2996_s10 = inlined_call_operand.vmem [shape: f32[6,96], index: 10, kind: input, shape index: {}]   ;;  %s2997_s11 = inlined_call_operand.vmem [shape: f32[16,96], index: 11, kind: input, shape index: {}]   ;;  %s2998_s12 = inlined_call_operand.vmem [shape: f32[64,6], index: 12, kind: input, shape index: {}]   ;;  %s2999_s13 = inlined_call_operand.vmem [shape: f32[2], index: 13, kind: input, shape index: {}]   ;;  %s3000_s14 = inlined_call_operand.hbm [shape: f32[2,8,128], index: 14, kind: output, shape index: {}]  }
   0x1   :  { %3006 = sst [smem:[#allocation12_spill]] %s2999_s13 }
   0x2   :  { %19 = vsyncpa [#allocation5], 0 }
   0x3   :  { %20 = vsyncpa [#allocation4], 0 }
   0x4   :  { %22 = vsyncpa [#allocation4 + $0x1], 0  ;;  %s2418_s29 = smov 0   ;;  %s2420_s30 = smov 0  }
   0x5   :  { %s2422_s15 = smov 0   ;;  %s2424_s16 = smov 0  }
   0x6 LB: > { %3007 = sst [smem:[#allocation9_spill]] %s2319_s15  ;;  %s2439_s17 = sadd.s32 4294967295, %s2323_s16   ;;  %s2323_s16 = sphi %s2424_s16, %s3016_s16   ;;  %s2319_s15 = sphi %s2422_s15, %s3018_s15   ;;  %s2315_s30 = sphi %s2420_s30, %s3020_s30   ;;  %s2311_s29 = sphi %s2418_s29, %s3019_s29  }
   0x7   : > { %s1941_s18 = sadd.s32 4294967294, %s2323_s16   ;;  %s2443_s19 = sadd.s32 1, %s2323_s16  }
   0x8   : > { %3008 = sst [smem:[#allocation10_spill]] %s2443_s19  ;;  %s334_s20 = sadd.s32 1, %s2319_s15 }
   0x9   : > { %s331_s21 = ssub.s32 %s2323_s16, %s2443_s19  ;;  %p344_p0 = scmp.ne.s32.totalorder %s2319_s15, %s2315_s30 }
   0xa   : > { %p332_p1 = scmp.eq.s32.totalorder %s331_s21, 0  ;;  %p345_p2 = scmp.eq.s32.totalorder %s2439_s17, 1 }
   0xb   : > { %p350_p3 = scmp.ne.s32.totalorder %s2315_s30, %s2311_s29  ;;  %p351_p4 = scmp.eq.s32.totalorder %s1941_s18, 1 }
   0xc   : > { %s2454_s22 = scalar_select %p332_p1, %s2319_s15, %s334_s20  }
   0xd   : > { %p2456_p5 = por %p345_p2, %p344_p0  ;;  %p2460_p6 = por %p351_p4, %p350_p3 }
   0xe   : > { %3009 = sst [smem:[#allocation11_spill]] %s2454_s22  ;;  %p1942_p7 = scmp.ge.s32.totalorder %s2323_s16, 1 }
   0xf   : > { %p358_p8 = scmp.lt.s32.totalorder %s2323_s16, 3  ;;  %p2149_p9 = scmp.eq.s32.totalorder %s2439_s17, 0 }
  0x10   : > { %s3013_s13 = sld [smem:[#allocation12_spill]] }
  0x11   : > { %p2467_p10 = pnand %p1942_p7, %p358_p8 }
  0x13   : > { %p2141_p11 = pneg %p2467_p10 }
  0x15   : > { %p2142_p12 = pnand %p2149_p9, %p2141_p11 }
  0x16   : > { %s407_s28 = sshll.u32 %s3013_s13, 4  ;;  %s408_s28 = int_to_ptr.vmem [resolvable:$true] %s407_s28 }
  0x17   : > { %s2242_s18 = scalar_lea.vmem %s408_s28, 16  ;;  %p2244_p0 = pneg %p2142_p12 }
  0x18   : > { %p2243_p13 = scmp.ne.s32.totalorder %s408_s28, %s2242_s18  ;;  %p2250_p3 = scmp.lt.s32.totalorder %s408_s28, %s408_s28 }
  0x19   : > { %p2251_p4 = scmp.lt.s32.totalorder %s2242_s18, %s2242_s18 }
  0x1a   : > { %p2245_p1 = pnand %p2244_p0, %p2243_p13 }
  0x1b   : > { %p2252_p7 = por %p2251_p4, %p2250_p3 }
  0x1c   : > { %p2246_p2 = pneg %p2245_p1 }
  0x1e   : > { %p2253_p8 = pnand %p2252_p7, %p2246_p2 }
  0x20   : > { %2256 = shalt.err (!%p2253_p8)
}
  0x21   : > { %s2325_s20 = smov [#allocation3]   ;;  %427 = sbr.rel (%p2467_p10) target bundleno = 1757 (0x6dd), region = 76 }
  0x22   : > { %2144 = dma.vmem_to_smem (!%p2142_p12), %s408_s28, 16, %s2325_s20, [#allocation5]  }
  0x28   : > { %2302 = dma.done.wait (%p2149_p9), [#allocation5], 16  }
  0x29   : > { %2304 = vsyncadd (%p2149_p9), [#allocation5], 4294967280 }
  0x2a   : > { %433 = sfence }
  0x2b   : > { %v581_v0 = vld [vmem:[%s2993_s7] sm:$0xff]  ;;  %v582_v1 = vld [vmem:[%s2993_s7 + $0x8] sm:$0xff]  ;;  %v583_v2 = vld [vmem:[%s2993_s7 + $0x10] sm:$0xff]  ;;  %v2326_v3 = vmov 0.0|0.0   ;;  %vm2327_vm0 = vmmov 0   ;;  %v2328_v6 = vmov 0.0  }
  0x2c   : > { %2104 = vmatprep.subr.bf16.mxu1 %v2326_v3  ;;  %v2105_v4 = vpack.c.bf16 %v582_v1, %v581_v0  ;;  %v584_v5 = vld [vmem:[%s2993_s7 + $0x18] sm:$0xff]  ;;  %2058 = vmatprep.mubr.msk.f32.mxu1 %vm2327_vm0, %v2328_v6  ;;  %p473_p9 = scmp.lt.s32.totalorder %s2439_s17, 1  ;;  %vm494_vm1 = vcmask 31744   ;;  %v585_v8 = vld [vmem:[%s2993_s7 + $0x20] sm:$0xff]  ;;  %v586_v9 = vld [vmem:[%s2993_s7 + $0x28] sm:$0xff]  ;;  %vm501_vm2 = vcmask 1043456  }
  0x2d   : > { %v2108_v7 = vpack.c.bf16 %v584_v5, %v583_v2  ;;  %v480_v10 = vld [vmem:[%s2987_s1] sm:$0xff]  ;;  %v2111_v11 = vpack.c.bf16 %v586_v9, %v585_v8  ;;  %v481_v13 = vld [vmem:[%s2987_s1 + $0x8] sm:$0x3f]  ;;  %v587_v14 = vld [vmem:[%s2993_s7 + $0x30] sm:$0xff]  ;;  %v2329_v31 = vmov 0   ;;  %vm773_vm3 = vcmask 130048  }
  0x2e   : > { %2106 = vmatpush3.bf16.msra.mxu1 %v2105_v4  ;;  %s474_s21 = scalar_select %p473_p9, %s2439_s17, 1  ;;  %2023 = vmatprep.mubr.msk.f32.mxu0 %vm494_vm1, %v480_v10  ;;  %v588_v15 = vld [vmem:[%s2993_s7 + $0x38] sm:$0xff]  ;;  %v589_v17 = vld [vmem:[%s2993_s7 + $0x40] sm:$0xff]  ;;  %v590_v18 = vld [vmem:[%s2993_s7 + $0x48] sm:$0xff]  ;;  %1098 = vst.msk [vmem:[#allocation2] sm:$0xff] %vm773_vm3, %v2328_v6  ;;  %vm769_vm4 = vcmask 1041408  }
  0x2f   : > { %2107 = vmatprep.subr.bf16.mxu1 %v2326_v3  ;;  %v2114_v16 = vpack.c.bf16 %v588_v15, %v587_v14  ;;  %v2117_v19 = vpack.c.bf16 %v590_v18, %v589_v17  ;;  %v591_v20 = vld [vmem:[%s2993_s7 + $0x50] sm:$0xff]  ;;  %v592_v21 = vld [vmem:[%s2993_s7 + $0x58] sm:$0xff]  ;;  %v593_v23 = vld [vmem:[%s2993_s7 + $0x60] sm:$0xff]  ;;  %2201 = vset.pattern.permute.xlu0 %v2329_v31  ;;  %1099 = vst.msk [vmem:[#allocation2 + $0x8] sm:$0xff] %vm773_vm3, %v2328_v6  ;;  %vm890_vm5 = vcmask 48128   ;;  %vm1106_vm6 = vcmask 128000  }
  0x30   : > { %s1948_s13 = sshll.u32 %s474_s21, 2  ;;  %v2120_v22 = vpack.c.bf16 %v592_v21, %v591_v20  ;;  %v594_v24 = vld [vmem:[%s2993_s7 + $0x68] sm:$0xff]  ;;  %v595_v26 = vld [vmem:[%s2993_s7 + $0x70] sm:$0xff]  ;;  %v596_v27 = vld [vmem:[%s2993_s7 + $0x78] sm:$0xff]  ;;  %1100 = vst.msk [vmem:[#allocation2 + $0x10] sm:$0xff] %vm773_vm3, %v2328_v6  ;;  %s2330_s18 = smov 112  }
  0x31   : > { %s476_s19 = scalar_lea.vmem %s2986_s0, %s1948_s13  ;;  %v2123_v25 = vpack.c.bf16 %v594_v24, %v593_v23  ;;  %v2126_v28 = vpack.c.bf16 %v596_v27, %v595_v26  ;;  %v667_v29 = vld [vmem:[%s2989_s3] sm:$0xff]  ;;  %v670_v32 = vld [vmem:[%s2990_s4 + $0x8] sm:$0xf]  ;;  %1101 = vst.msk [vmem:[#allocation2 + $0x18] sm:$0xff] %vm773_vm3, %v2328_v6  ;;  %1102 = vst.msk [vmem:[#allocation2 + $0x20] sm:$0xff] %vm773_vm3, %v2328_v6  ;;  %s2331_s28 = smov 96  }
  0x32   : > { %2109 = vmatpush3.bf16.msra.mxu1 %v2108_v7  ;;  %v479_v12 = vld [vmem:[%s476_s19] sm:$0xf]  ;;  %v668_v36 = vld [vmem:[%s2989_s3 + $0x8] sm:$0xf]  ;;  %1103 = vst.msk [vmem:[#allocation2 + $0x28] sm:$0xff] %vm773_vm3, %v2328_v6  ;;  %1104 = vst.msk [vmem:[#allocation2 + $0x30] sm:$0xff] %vm773_vm3, %v2328_v6 }
  0x33   : > { %2110 = vmatprep.subr.bf16.mxu1 %v2326_v3  ;;  %2021 = vmatprep.subr.msk.mxu0 %vm501_vm2, %v479_v12  ;;  %v669_v30 = vld [vmem:[%s2990_s4] sm:$0xff]  ;;  %v766_v39 = vld [vmem:[%s2994_s8 + $0x8] sm:$0xff]  ;;  %1105 = vst.msk [vmem:[#allocation2 + $0x38] sm:$0xff] %vm773_vm3, %v2328_v6  ;;  %s2332_s25 = smov 80   ;;  %s2333_s15 = smov 64   ;;  %vm897_vm7 = vcmask 1045504  }
  0x34   : > { %2022 = vmatpush3.msk.msra.mxu0 %vm501_vm2, %v479_v12  ;;  %673 = vperm.xlu0 %2201, %v669_v30   ;;  %v765_v38 = vld [vmem:[%s2994_s8] sm:$0xff]  ;;  %v483_v50 = vld [vmem:[%s2988_s2 + $0x8] sm:$0x3f]  ;;  %s2334_s19 = smov 48   ;;  %s3004_s22 = smov 32   ;;  %v2645_v7 = vld [vmem:[%s2998_s12 + $0x10] sm:$0xff] }
  0x35   : > { %2024 = vmatmul.mubr.msk.f32.vlgmr.msra.gmra.mrb[0].mxu0 %vm494_vm1, %v481_v13  ;;  %v2129_v40 = vpack.c.bf16 %v766_v39, %v765_v38  ;;  %s3005_s13 = smov 16   ;;  %v846_v56 = vld [vmem:[%s2995_s9] sm:$0x3f]  ;;  %v2652_v8 = vld [vmem:[%s2998_s12 + $0x18] sm:$0xff]  ;;  %v2338_v10 = vmov 2   ;;  %v2674_v13 = vld [vmem:[%s2998_s12 + $0x28] sm:$0xff] }
  0x36   : > { %2112 = vmatpush3.bf16.msra.mxu1 %v2111_v11  ;;  %2063 = vmatprep.mubr.msk.f32.mxu0 %vm494_vm1, %v667_v29  ;;  %v856_v57 = vld [vmem:[%s2996_s10] sm:$0x3f]  ;;  %v2339_v11 = vmov 3   ;;  %v2682_v14 = vld [vmem:[%s2998_s12 + $0x38] sm:$0xff]  ;;  %v2340_v15 = vmov 4   ;;  %v2341_v17 = vmov 5  }
  0x37   : > { %2113 = vmatprep.subr.bf16.mxu1 %v2326_v3  ;;  %v2658_v9 = vld [vmem:[%s2998_s12 + $0x20] sm:$0xff]  ;;  %vm848_vm8 = vcmask 783360   ;;  %vm976_vm9 = vcmask 785408   ;;  %s1949_s27 = sld [smem:[#allocation3 + $0x1]]  ;;  %s477_s21 = sld [smem:[#allocation3]]  ;;  %vm1759_vm10 = vcmask 261120  }
  0x38   : > { %678 = vperm.xlu0 %2201, %v670_v32   ;;  %vm1761_vm11 = vcmask 392192   ;;  %vm1763_vm12 = vcmask 523264   ;;  %vm1765_vm13 = vcmask 654336   ;;  %vm1768_vm14 = vcmask 916480  }
  0x3a   : > { %2115 = vmatpush3.bf16.msra.mxu1 %v2114_v16  ;;  %v2695_v16 = vld [vmem:[%s2998_s12 + $0x30] sm:$0xff] }
  0x3b   : > { %2116 = vmatprep.subr.bf16.mxu1 %v2326_v3 }
  0x3e   : > { %2118 = vmatpush3.bf16.msra.mxu1 %v2117_v19 }
  0x3f   : > { %2119 = vmatprep.subr.bf16.mxu1 %v2326_v3 }
  0x42   : > { %2121 = vmatpush3.bf16.msra.mxu1 %v2120_v22  ;;  %v2722_v22 = vld [vmem:[%s2998_s12] sm:$0xff] }
  0x43   : > { %2122 = vmatprep.subr.bf16.mxu1 %v2326_v3 }
  0x46   : > { %2124 = vmatpush3.bf16.msra.mxu1 %v2123_v25 }
  0x47   : > { %2125 = vmatprep.subr.bf16.mxu1 %v2326_v3 }
  0x4a   : > { %2127 = vmatpush3.bf16.msra.mxu1 %v2126_v28 }
  0x4b   : > { %2099 = vmatprep.subr.mxu1 %v2328_v6 }
  0x4d   : > { %2059 = vmatmul.mubr.f32.vlgmr.msra.gmra.mrb[0].mxu1 %v479_v12  ;;  %v2667_v12 = vld [vmem:[%s2998_s12 + $0x8] sm:$0xff] }
  0x4e   : > { %2101 = vmatprep.mubr.msk.f32.mxu1 %vm2327_vm0, %v2328_v6 }
  0xb3   : > { %v674_v41 = vpop.permute.xlu0 %673 }
  0xb7   : > { %v679_v42 = vpop.permute.xlu0 %678 }
 0x108   : > { %v2025_v33 = vpop.f32.mrb[0].mxu0 }
 0x109   : > { %v2571_v34 = vpop.f32.mrb[1].mxu0 }
 0x120   : > { %v663_v35 = vpop.f32.mrb[0].mxu1 }
 0x121   : > { %v2060_v37 = vpop.f32.mrb[1].mxu1  ;;  %2061 = vmatprep.subr.msk.mxu0 %vm501_vm2, %v663_v35 }
 0x122   : > { %2062 = vmatpush3.msk.msra.mxu0 %vm501_vm2, %v663_v35 }
 0x123   : > { %2064 = vmatmul.mubr.msk.f32.vlgmr.msra.gmra.mrb[2].mxu0 %vm494_vm1, %v668_v36  ;;  %2128 = vmatprep.subr.bf16.mxu0 %v2326_v3 }
 0x124   : > { %2070 = vmatprep.mubr.msk.f32.mxu0 %vm2327_vm0, %v2328_v6  ;;  %2130 = vmatpush3.bf16.msra.mxu0 %v2129_v40  ;;  %v2337_v6 = vmov 1  }
 0x125   : > { %2203 = vset.pattern.permute.xlu0 %v2337_v6 }
 0x1f6   : > { %v2065_v43 = vpop.f32.mrb[2].mxu0 }
 0x1f7   : > { %v762_v44 = vadd.f32 %v2065_v43, %v679_v42  ;;  %v756_v45 = vpop.f32.mrb[3].mxu0 }
 0x1f8   : > { %v757_v46 = vadd.f32 %v756_v45, %v674_v41 }
 0x1f9   : > { %v771_v47 = vrot.slane %v762_v44, 6 }
 0x1fa   : > { %v770_v48 = vrot.slane %v757_v46, 6  ;;  %858 = vxpose.xlu1.b32.start.end [1/1] (short) (narrow) %v757_v46, 16 }
 0x1fc   : > { %v772_v49 = vsel %vm769_vm4, %v770_v48, %v771_v47 }
 0x1fd   : > { %2071 = vmatmul.mubr.msk.f32.vlgmr.msra.gmra.mrb[4].mxu0 %vm773_vm3, %v772_v49 }
 0x218   : > { %2202 = vset.pattern.permute.xlu1 %v2329_v31 }
 0x21c   : > { %491 = vperm.xlu1 %2202, %v483_v50  }
 0x220   : > { %2204 = vset.pattern.permute.xlu1 %v2337_v6 }
 0x221   : > { %1339 = vperm.xlu1 %2204, %v2645_v7  }
 0x225   : > { %1343 = vperm.xlu1 %2204, %v2652_v8  }
 0x229   : > { %1347 = vperm.xlu1 %2204, %v2658_v9  }
 0x22d   : > { %2205 = vset.pattern.permute.xlu1 %v2338_v10 }
 0x22e   : > { %1419 = vperm.xlu1 %2205, %v2645_v7  }
 0x232   : > { %1423 = vperm.xlu1 %2205, %v2652_v8  }
 0x236   : > { %2206 = vset.pattern.permute.xlu1 %v2339_v11 }
 0x237   : > { %1495 = vperm.xlu1 %2206, %v2667_v12  }
 0x23b   : > { %2208 = vset.pattern.permute.xlu1 %v2338_v10 }
 0x23c   : > { %1427 = vperm.xlu1 %2208, %v2658_v9  }
 0x240   : > { %2209 = vset.pattern.permute.xlu1 %v2337_v6 }
 0x241   : > { %1359 = vperm.xlu1 %2209, %v2682_v14  }
 0x245   : > { %2210 = vset.pattern.permute.xlu1 %v2338_v10 }
 0x246   : > { %1431 = vperm.xlu1 %2210, %v2674_v13  }
 0x24a   : > { %2211 = vset.pattern.permute.xlu1 %v2340_v15 }
 0x24b   : > { %1575 = vperm.xlu1 %2211, %v2667_v12  }
 0x24f   : > { %2212 = vset.pattern.permute.xlu1 %v2339_v11 }
 0x250   : > { %1507 = vperm.xlu1 %2212, %v2658_v9  }
 0x254   : > { %2213 = vset.pattern.permute.xlu1 %v2340_v15 }
 0x255   : > { %1579 = vperm.xlu1 %2213, %v2645_v7  }
 0x259   : > { %2214 = vset.pattern.permute.xlu1 %v2339_v11 }
 0x25a   : > { %1511 = vperm.xlu1 %2214, %v2674_v13  }
 0x25e   : > { %2215 = vset.pattern.permute.xlu1 %v2341_v17 }
 0x25f   : > { %1655 = vperm.xlu1 %2215, %v2667_v12  }
 0x263   : > { %2216 = vset.pattern.permute.xlu1 %v2339_v11 }
 0x264   : > { %1515 = vperm.xlu1 %2216, %v2695_v16  }
 0x268   : > { %2217 = vset.pattern.permute.xlu1 %v2341_v17 }
 0x269   : > { %1659 = vperm.xlu1 %2217, %v2645_v7  }
 0x26d   : > { %2218 = vset.pattern.permute.xlu1 %v2340_v15 }
 0x26e   : > { %1591 = vperm.xlu1 %2218, %v2674_v13  }
 0x272   : > { %2219 = vset.pattern.permute.xlu1 %v2341_v17 }
 0x273   : > { %1663 = vperm.xlu1 %2219, %v2652_v8  }
 0x277   : > { %1667 = vperm.xlu1 %2219, %v2658_v9  }
 0x27a   : > { %v874_v51 = vpop.trf.xlu1 }
 0x27b   : > { %2075 = vmatprep.mubr.msk.f32.mxu0 %vm890_vm5, %v874_v51  ;;  %2220 = vset.pattern.permute.xlu1 %v2340_v15 }
 0x27c   : > { %1599 = vperm.xlu1 %2220, %v2682_v14  }
 0x27e   : > { %v875_v52 = vpop.trf.xlu1 }
 0x280   : > { %2223 = vset.pattern.permute.xlu1 %v2341_v17 }
 0x281   : > { %1675 = vperm.xlu1 %2223, %v2695_v16  }
 0x285   : > { %1679 = vperm.xlu1 %2223, %v2682_v14  }
 0x289   : > { %2224 = vset.pattern.permute.xlu1 %v2337_v6 }
 0x28a   : > { %1331 = vperm.xlu1 %2224, %v2722_v22  }
 0x28e   : > { %2225 = vset.pattern.permute.xlu1 %v2329_v31 }
 0x28f   : > { %1294 = vperm.xlu1 %2225, %v2645_v7  }
 0x293   : > { %2226 = vset.pattern.permute.xlu1 %v2338_v10 }
 0x294   : > { %1411 = vperm.xlu1 %2226, %v2722_v22  }
 0x298   : > { %2227 = vset.pattern.permute.xlu1 %v2329_v31 }
 0x299   : > { %1309 = vperm.xlu1 %2227, %v2674_v13  }
 0x29b   : > { %v492_v53 = vpop.permute.xlu1 %491 }
 0x29c   : > { %v577_v54 = vadd.f32 %v2025_v33, %v492_v53 }
 0x29d   : > { %1314 = vperm.xlu1 %2227, %v2695_v16  }
 0x29e   : > { %v580_v55 = vmax.f32 %v577_v54, 0.0 }
 0x2a0   : > { %1107 = vst.msk [vmem:[#allocation2] sm:$0x3f] %vm1106_vm6, %v580_v55  ;;  %1109 = vrot.lane.b32.xlu0 %v580_v55, %s2330_s18 }
 0x2a1   : > { %1319 = vperm.xlu1 %2227, %v2682_v14  }
 0x2a4   : > { %1113 = vrot.lane.b32.xlu0 %v580_v55, %s2331_s28 }
 0x2a5   : > { %2230 = vset.pattern.permute.xlu1 %v2341_v17 }
 0x2a6   : > { %1651 = vperm.xlu1 %2230, %v2722_v22  }
 0x2a7   : > { %v1137_v62 = vld [vmem:[#allocation2] sm:$0xff] }
 0x2a8   : > { %1117 = vrot.lane.b32.xlu0 %v580_v55, %s2332_s25 }
 0x2aa   : > { %2231 = vset.pattern.permute.xlu1 %v2329_v31 }
 0x2ac   : > { %1121 = vrot.lane.b32.xlu0 %v580_v55, %s2333_s15 }
 0x2b0   : > { %1125 = vrot.lane.b32.xlu0 %v580_v55, %s2334_s19 }
 0x2b4   : > { %1129 = vrot.lane.b32.xlu0 %v580_v55, %s3004_s22 }
 0x2b8   : > { %1133 = vrot.lane.b32.xlu0 %v580_v55, %s3005_s13  ;;  %s1974_s13 = sshll.u32 %s2439_s17, 7  ;;  %s2342_s17 = smov [#allocation6]  }
 0x2b9   : > { %s2944_s20 = scalar_lea.hbm %s3000_s14, %s1974_s13 }
 0x2bc   : > { %1335 = vperm.xlu0 %2203, %v2667_v12  }
 0x2c0   : > { %1351 = vperm.xlu0 %2203, %v2674_v13  }
 0x2c4   : > { %1355 = vperm.xlu0 %2203, %v2695_v16  }
 0x2c8   : > { %2207 = vset.pattern.permute.xlu0 %v2338_v10 }
 0x2c9   : > { %1415 = vperm.xlu0 %2207, %v2667_v12  }
 0x2cd   : > { %1435 = vperm.xlu0 %2207, %v2695_v16  }
 0x2d0   : > { %v842_v58 = vpop.f32.mrb[4].mxu0 }
 0x2d1   : > { %v2624_v59 = vmul.f32 %v846_v56, %v842_v58  ;;  %v857_v60 = vmul.f32 %v856_v57, %v842_v58  ;;  %v2072_v61 = vpop.f32.mrb[5].mxu0  ;;  %1439 = vperm.xlu0 %2207, %v2682_v14  }
 0x2d3   : > { %2073 = vmatprep.subr.msk.mxu0 %vm897_vm7, %v857_v60  ;;  %v849_v18 = vsel %vm848_vm8, %v2624_v59, 0.0  ;;  %v1084_v59 = vstv %s1949_s27  ;;  %s3014_s27 = smov 16  }
 0x2d4   : > { %2074 = vmatpush3.msk.msra.mxu0 %vm897_vm7, %v857_v60  ;;  %v850_v19 = vrot.slane %v849_v18, 4 }
 0x2d5   : > { %2076 = vmatmul.mubr.msk.f32.vlgmr.msra.gmra.mrb[6].mxu0 %vm890_vm5, %v875_v52  ;;  %2078 = vmatprep.subr.msk.mxu0 %vm897_vm7, %v846_v56 }
 0x2d6   : > { %2080 = vmatprep.mubr.msk.f32.mxu0 %vm890_vm5, %v874_v51  ;;  %2079 = vmatpush3.msk.msra.mxu0 %vm897_vm7, %v846_v56  ;;  %v851_v20 = vadd.f32 %v850_v19, %v849_v18  ;;  %v1340_v18 = vpop.permute.xlu1 %1339 }
 0x2d7   : > { %2221 = vset.pattern.permute.xlu0 %v2341_v17 }
 0x2d8   : > { %1671 = vperm.xlu0 %2221, %v2674_v13   ;;  %v852_v21 = vrot.slane %v851_v20, 2 }
 0x2d9   : > { %2081 = vmatmul.mubr.msk.f32.vlgmr.msra.gmra.mrb[8].mxu0 %vm890_vm5, %v875_v52 }
 0x2da   : > { %2087 = vmatprep.mubr.msk.f32.mxu0 %vm773_vm3, %v1137_v62  ;;  %v853_v23 = vadd.f32 %v852_v21, %v851_v20  ;;  %v1344_v19 = vpop.permute.xlu1 %1343 }
 0x2dc   : > { %2222 = vset.pattern.permute.xlu0 %v2339_v11  ;;  %v854_v24 = vrot.slane %v853_v23, 1 }
 0x2dd   : > { %1499 = vperm.xlu0 %2222, %v2645_v7  }
 0x2de   : > { %v855_v30 = vadd.f32 %v854_v24, %v853_v23  ;;  %v2765_v20 = vpop.permute.xlu1 %1347 }
 0x2e1   : > { %1503 = vperm.xlu0 %2222, %v2652_v8  }
 0x2e2   : > { %v1420_v21 = vpop.permute.xlu1 %1419 }
 0x2e5   : > { %1519 = vperm.xlu0 %2222, %v2682_v14  }
 0x2e6   : > { %v1424_v23 = vpop.permute.xlu1 %1423 }
 0x2e9   : > { %1491 = vperm.xlu0 %2222, %v2722_v22  }
 0x2ea   : > { %v1496_v24 = vpop.permute.xlu1 %1495 }
 0x2ed   : > { %2228 = vset.pattern.permute.xlu0 %v2340_v15 }
 0x2ee   : > { %1583 = vperm.xlu0 %2228, %v2652_v8  }
 0x2f2   : > { %1587 = vperm.xlu0 %2228, %v2658_v9  }
 0x2f6   : > { %1595 = vperm.xlu0 %2228, %v2695_v16  }
 0x2fa   : > { %1571 = vperm.xlu0 %2228, %v2722_v22  }
 0x2fe   : > { %2229 = vset.pattern.permute.xlu0 %v2329_v31  ;;  %v1082_v31 = vld [vmem:[%s2997_s11] sm:$0xff] }
 0x2ff   : > { %1289 = vperm.xlu0 %2229, %v2667_v12  }
 0x303   : > { %1299 = vperm.xlu0 %2229, %v2652_v8  }
 0x307   : > { %1304 = vperm.xlu0 %2229, %v2658_v9  }
 0x312   : > { %v1110_v63 = vpop.permute.xlu0 %1109 }
 0x313   : > { %1112 = vst.msk [vmem:[#allocation2 + $0x8] sm:$0x3f] %vm1106_vm6, %v1110_v63 }
 0x316   : > { %v1114_v0 = vpop.permute.xlu0 %1113 }
 0x317   : > { %1116 = vst.msk [vmem:[#allocation2 + $0x10] sm:$0x3f] %vm1106_vm6, %v1114_v0  ;;  %v1083_v0 = vld [vmem:[%s2997_s11 + $0x8] sm:$0xff] }
 0x31a   : > { %v1118_v1 = vpop.permute.xlu0 %1117  ;;  %v1138_v11 = vld [vmem:[#allocation2 + $0x8] sm:$0xff] }
 0x31b   : > { %1120 = vst.msk [vmem:[#allocation2 + $0x18] sm:$0x3f] %vm1106_vm6, %v1118_v1  ;;  %v1093_v1 = vstv %s477_s21  ;;  %s3015_s21 = smov 32  }
 0x31e   : > { %v1122_v2 = vpop.permute.xlu0 %1121  ;;  %v1139_v12 = vld [vmem:[#allocation2 + $0x10] sm:$0xff] }
 0x31f   : > { %1124 = vst.msk [vmem:[#allocation2 + $0x20] sm:$0x3f] %vm1106_vm6, %v1122_v2 }
 0x322   : > { %v1126_v3 = vpop.permute.xlu0 %1125  ;;  %v1140_v13 = vld [vmem:[#allocation2 + $0x18] sm:$0xff] }
 0x323   : > { %1128 = vst.msk [vmem:[#allocation2 + $0x28] sm:$0x3f] %vm1106_vm6, %v1126_v3 }
 0x326   : > { %v1130_v4 = vpop.permute.xlu0 %1129  ;;  %v1141_v14 = vld [vmem:[#allocation2 + $0x20] sm:$0xff] }
 0x327   : > { %1132 = vst.msk [vmem:[#allocation2 + $0x30] sm:$0x3f] %vm1106_vm6, %v1130_v4 }
 0x32a   : > { %v1134_v5 = vpop.permute.xlu0 %1133  ;;  %v1142_v15 = vld [vmem:[#allocation2 + $0x28] sm:$0xff] }
 0x32b   : > { %1136 = vst.msk [vmem:[#allocation2 + $0x38] sm:$0x3f] %vm1106_vm6, %v1134_v5 }
 0x32e   : > { %v1143_v16 = vld [vmem:[#allocation2 + $0x30] sm:$0xff] }
 0x332   : > { %v1144_v17 = vld [vmem:[#allocation2 + $0x38] sm:$0xff] }
 0x3a8   : > { %v2077_v25 = vpop.f32.mrb[6].mxu0 }
 0x3a9   : > { %v978_v26 = vsel %vm976_vm9, %v2077_v25, -inf  ;;  %v967_v27 = vpop.f32.mrb[7].mxu0 }
 0x3aa   : > { %v977_v28 = vsel %vm976_vm9, %v967_v27, -inf }
 0x3ab   : > { %v979_v29 = vmax.f32 %v977_v28, %v978_v26  ;;  %v1428_v26 = vpop.permute.xlu1 %1427 }
 0x3ac   : > { %v2082_v32 = vpop.f32.mrb[8].mxu0 }
 0x3ad   : > { %v980_v33 = vrot.slane %v979_v29, 4  ;;  %v1090_v35 = vsub.f32 %v2082_v32, %v855_v30  ;;  %v1073_v36 = vpop.f32.mrb[9].mxu0 }
 0x3ae   : > { %v1089_v37 = vsub.f32 %v1073_v36, %v855_v30 }
 0x3af   : > { %v981_v38 = vmax.f32 %v979_v29, %v980_v33  ;;  %v2769_v28 = vpop.permute.xlu1 %1359 }
 0x3b1   : > { %v982_v39 = vrot.slane %v981_v38, 2 }
 0x3b3   : > { %v983_v40 = vmax.f32 %v981_v38, %v982_v39  ;;  %v2773_v30 = vpop.permute.xlu1 %1431 }
 0x3b5   : > { %v984_v41 = vrot.slane %v983_v40, 1 }
 0x3b7   : > { %v985_v42 = vmax.f32 %v983_v40, %v984_v41  ;;  %v1576_v33 = vpop.permute.xlu1 %1575 }
 0x3b9   : > { %v986_v43 = vsub.f32 %v967_v27, %v985_v42  ;;  %v987_v44 = vsub.f32 %v2077_v25, %v985_v42  ;;  %v1336_v25 = vpop.permute.xlu0 %1335 }
 0x3bb   : > { %v988_v45 = vmul.f32 1.442695, %v986_v43  ;;  %v990_v46 = vmul.f32 1.442695, %v987_v44  ;;  %v2777_v36 = vpop.permute.xlu1 %1507 }
 0x3bd   : > { %2232 = vpow2.f32 %v988_v45  ;;  %v2767_v27 = vpop.permute.xlu0 %1351 }
 0x3be   : > { %2234 = vpow2.f32 %v990_v46 }
 0x3bf   : > { %v1580_v38 = vpop.permute.xlu1 %1579 }
 0x3c1   : > { %v2771_v29 = vpop.permute.xlu0 %1355 }
 0x3c3   : > { %v1512_v40 = vpop.permute.xlu1 %1511 }
 0x3c5   : > { %v1416_v32 = vpop.permute.xlu0 %1415 }
 0x3c7   : > { %v2233_v47 = vpop.eup %2232  ;;  %v1656_v42 = vpop.permute.xlu1 %1655 }
 0x3c8   : > { %v2235_v48 = vpop.eup %2234  ;;  %v992_v49 = vsel %vm976_vm9, %v2233_v47, 0.0 }
 0x3c9   : > { %v993_v50 = vsel %vm976_vm9, %v2235_v48, 0.0 }
 0x3ca   : > { %v994_v51 = vadd.f32 %v993_v50, %v992_v49 }
 0x3cb   : > { %v2783_v44 = vpop.permute.xlu1 %1515 }
 0x3cc   : > { %v995_v52 = vrot.slane %v994_v51, 4 }
 0x3ce   : > { %v996_v53 = vadd.f32 %v995_v52, %v994_v51 }
 0x3cf   : > { %v1660_v46 = vpop.permute.xlu1 %1659 }
 0x3d0   : > { %v997_v54 = vrot.slane %v996_v53, 2 }
 0x3d2   : > { %v998_v55 = vadd.f32 %v997_v54, %v996_v53 }
 0x3d3   : > { %v1592_v52 = vpop.permute.xlu1 %1591 }
 0x3d4   : > { %v999_v56 = vrot.slane %v998_v55, 1 }
 0x3d6   : > { %v1000_v57 = vadd.f32 %v999_v56, %v998_v55 }
 0x3d8   : > { %2236 = vrcp.f32 %v1000_v57 }
 0x3d9   : > { %2238 = vtanh.f32 %v1090_v35  ;;  %v2775_v35 = vpop.permute.xlu0 %1435 }
 0x3da   : > { %2240 = vtanh.f32 %v1089_v37 }
 0x3dd   : > { %v2779_v37 = vpop.permute.xlu0 %1439 }
 0x3e1   : > { %v2781_v39 = vpop.permute.xlu0 %1671 }
 0x3e2   : > { %v2237_v58 = vpop.eup %2236 }
 0x3e3   : > { %v2239_v60 = vpop.eup %2238  ;;  %v1002_v61 = vmul.f32 %v2237_v58, %v2233_v47  ;;  %v1003_v62 = vmul.f32 %v2237_v58, %v2235_v48  ;;  %v1664_v58 = vpop.permute.xlu1 %1663 }
 0x3e4   : > { %v2241_v63 = vpop.eup %2240  ;;  %v1095_v7 = vmul.f32 %v2239_v60, %v1093_v1 }
 0x3e5   : > { %v1085_v2 = vmul.f32 %v1084_v59, %v1002_v61  ;;  %v1086_v3 = vmul.f32 %v1084_v59, %v1003_v62  ;;  %v1094_v6 = vmul.f32 %v2241_v63, %v1093_v1  ;;  %v1500_v41 = vpop.permute.xlu0 %1499 }
 0x3e7   : > { %v1087_v4 = vadd.f32 %v1085_v2, %v1082_v31  ;;  %v1088_v5 = vadd.f32 %v1086_v3, %v1083_v0 }
 0x3e9   : > { %v1096_v8 = vadd.f32 %v1094_v6, %v1087_v4  ;;  %v1097_v9 = vadd.f32 %v1095_v7, %v1088_v5  ;;  %v1504_v43 = vpop.permute.xlu0 %1503  ;;  %v1668_v4 = vpop.permute.xlu1 %1667 }
 0x3eb   : > { %v2131_v10 = vpack.c.bf16 %v1097_v9, %v1096_v8 }
 0x3ed   : > { %2132 = vmatprep.subr.bf16.mxu0 %v2131_v10  ;;  %v2785_v45 = vpop.permute.xlu0 %1519  ;;  %v1600_v7 = vpop.permute.xlu1 %1599 }
 0x3ee   : > { %2134 = vmatpush3.bf16.msra.mxu0 %v2131_v10 }
 0x3f1   : > { %2088 = vmatmul.mubr.msk.f32.vlgmr.msra.gmra.mrb[10].mxu0 %vm773_vm3, %v1138_v11  ;;  %v1492_v48 = vpop.permute.xlu0 %1491 }
 0x3f2   : > { %2090 = vmatprep.mubr.msk.f32.mxu0 %vm773_vm3, %v1139_v12  ;;  %v1676_v12 = vpop.permute.xlu1 %1675 }
 0x3f5   : > { %2091 = vmatmul.mubr.msk.f32.gmra.mrb[12].mxu0 %vm773_vm3, %v1140_v13  ;;  %v1584_v31 = vpop.permute.xlu0 %1583 }
 0x3f6   : > { %2093 = vmatprep.mubr.msk.f32.mxu0 %vm773_vm3, %v1141_v14 }
 0x3f9   : > { %2094 = vmatmul.mubr.msk.f32.gmra.mrb[14].mxu0 %vm773_vm3, %v1142_v15  ;;  %v1680_v15 = vpop.permute.xlu1 %1679 }
 0x3fa   : > { %2096 = vmatprep.mubr.msk.f32.mxu0 %vm773_vm3, %v1143_v16 }
 0x3fd   : > { %2097 = vmatmul.mubr.msk.f32.gmra.mrb[16].mxu0 %vm773_vm3, %v1144_v17 }
 0x4c4   : > { %v2787_v47 = vpop.f32.mrb[10].mxu0 }
 0x4c5   : > { %v2789_v49 = vpop.f32.mrb[11].mxu0  ;;  %v1443_v50 = vmul.f32 %v2787_v47, %v1416_v32  ;;  %v1363_v51 = vmul.f32 %v2787_v47, %v1336_v25  ;;  %v1603_v56 = vmul.f32 %v2787_v47, %v1576_v33  ;;  %v1523_v57 = vmul.f32 %v2787_v47, %v1496_v24  ;;  %v1588_v25 = vpop.permute.xlu0 %1587 }
 0x4c6   : > { %v2794_v53 = vmul.f32 %v1492_v48, %v2789_v49  ;;  %v1683_v61 = vmul.f32 %v2787_v47, %v1656_v42 }
 0x4c7   : > { %1460 = vrot.lane.b32.xlu0 %v1443_v50, %s2331_s28  ;;  %1380 = vrot.lane.b32.xlu1 %v1363_v51, %s2330_s18 }
 0x4c8   : > { %v2798_v54 = vpop.f32.mrb[12].mxu0 }
 0x4c9   : > { %v2800_v55 = vpop.f32.mrb[13].mxu0  ;;  %v1445_v62 = vmul.f32 %v2798_v54, %v1424_v23  ;;  %v1605_v2 = vmul.f32 %v2798_v54, %v1584_v31  ;;  %v1365_v3 = vmul.f32 %v2798_v54, %v1344_v19  ;;  %v1525_v5 = vmul.f32 %v2798_v54, %v1504_v43 }
 0x4ca   : > { %v1364_v6 = vmul.f32 %v1340_v18, %v2800_v55  ;;  %v1685_v8 = vmul.f32 %v2798_v54, %v1664_v58  ;;  %v1444_v9 = vmul.f32 %v1420_v21, %v2800_v55  ;;  %v1604_v10 = vmul.f32 %v1580_v38, %v2800_v55  ;;  %v1332_v21 = vpop.permute.xlu1 %1331 }
 0x4cb   : > { %1620 = vrot.lane.b32.xlu0 %v1603_v56, %s2333_s15  ;;  %1540 = vrot.lane.b32.xlu1 %v1523_v57, %s2332_s25  ;;  %v1524_v11 = vmul.f32 %v1500_v41, %v2800_v55  ;;  %v1684_v13 = vmul.f32 %v1660_v46, %v2800_v55  ;;  %v1362_v46 = vmul.f32 %v1332_v21, %v2789_v49 }
 0x4cc   : > { %v2806_v59 = vpop.f32.mrb[14].mxu0 }
 0x4cd   : > { %v2808_v60 = vpop.f32.mrb[15].mxu0  ;;  %v1367_v14 = vmul.f32 %v2806_v59, %v2767_v27  ;;  %v1447_v16 = vmul.f32 %v2806_v59, %v2773_v30  ;;  %v1527_v17 = vmul.f32 %v2806_v59, %v1512_v40  ;;  %v1607_v18 = vmul.f32 %v2806_v59, %v1592_v52 }
 0x4ce   : > { %v1446_v63 = vmul.f32 %v1428_v26, %v2808_v60  ;;  %v1366_v19 = vmul.f32 %v2765_v20, %v2808_v60  ;;  %v1526_v23 = vmul.f32 %v2777_v36, %v2808_v60  ;;  %v2854_v24 = vpop.permute.xlu1 %1294  ;;  %v1606_v26 = vmul.f32 %v1588_v25, %v2808_v60 }
 0x4cf   : > { %1700 = vrot.lane.b32.xlu1 %v1683_v61, %s2334_s19  ;;  %1464 = vrot.lane.b32.xlu0 %v1445_v62, %s2331_s28  ;;  %v1686_v27 = vmul.f32 %v1668_v4, %v2808_v60  ;;  %v1687_v43 = vmul.f32 %v2806_v59, %v2781_v39 }
 0x4d0   : > { %v2815_v0 = vpop.f32.mrb[16].mxu0 }
 0x4d1   : > { %v2817_v1 = vpop.f32.mrb[17].mxu0  ;;  %v1449_v20 = vmul.f32 %v2815_v0, %v2779_v37  ;;  %v1609_v30 = vmul.f32 %v2815_v0, %v1600_v7  ;;  %v1369_v33 = vmul.f32 %v2815_v0, %v2769_v28  ;;  %v1529_v38 = vmul.f32 %v2815_v0, %v2785_v45  ;;  %v1596_v28 = vpop.permute.xlu0 %1595 }
 0x4d2   : > { %v1412_v32 = vpop.permute.xlu1 %1411  ;;  %v1368_v36 = vmul.f32 %v2771_v29, %v2817_v1  ;;  %v1528_v40 = vmul.f32 %v2783_v44, %v2817_v1  ;;  %v1448_v29 = vmul.f32 %v2775_v35, %v2817_v1  ;;  %v1608_v41 = vmul.f32 %v1596_v28, %v2817_v1 }
 0x4d3   : > { %1624 = vrot.lane.b32.xlu0 %v1605_v2, %s2333_s15  ;;  %1384 = vrot.lane.b32.xlu1 %v1365_v3, %s2330_s18  ;;  %v1688_v44 = vmul.f32 %v1676_v12, %v2817_v1  ;;  %v1689_v35 = vmul.f32 %v2815_v0, %v1680_v15  ;;  %v1442_v39 = vmul.f32 %v1412_v32, %v2789_v49 }
 0x4d4   : > { %v1324_v15 = vmul.f32 %v2854_v24, %v2800_v55 }
 0x4d5   : > { %v1572_v51 = vpop.permute.xlu0 %1571 }
 0x4d6   : > { %v2871_v37 = vpop.permute.xlu1 %1309  ;;  %v1602_v52 = vmul.f32 %v1572_v51, %v2789_v49 }
 0x4d7   : > { %1544 = vrot.lane.b32.xlu1 %v1525_v5, %s2332_s25  ;;  %1382 = vrot.lane.b32.xlu0 %v1364_v6, %s2330_s18  ;;  %v1327_v51 = vmul.f32 %v2806_v59, %v2871_v37 }
 0x4da   : > { %v2882_v42 = vpop.permute.xlu1 %1314 }
 0x4db   : > { %1704 = vrot.lane.b32.xlu1 %v1685_v8, %s2334_s19  ;;  %1462 = vrot.lane.b32.xlu0 %v1444_v9, %s2331_s28 }
 0x4de   : > { %v2891_v45 = vpop.permute.xlu1 %1319 }
 0x4df   : > { %1622 = vrot.lane.b32.xlu1 %v1604_v10, %s2333_s15  ;;  %1542 = vrot.lane.b32.xlu0 %v1524_v11, %s2332_s25 }
 0x4e2   : > { %v1652_v48 = vpop.permute.xlu1 %1651 }
 0x4e3   : > { %1702 = vrot.lane.b32.xlu0 %v1684_v13, %s2334_s19  ;;  %1388 = vrot.lane.b32.xlu1 %v1367_v14, %s2330_s18  ;;  %v1682_v50 = vmul.f32 %v1652_v48, %v2789_v49 }
 0x4e7   : > { %1468 = vrot.lane.b32.xlu0 %v1447_v16, %s2331_s28  ;;  %1548 = vrot.lane.b32.xlu1 %v1527_v17, %s2332_s25 }
 0x4eb   : > { %1628 = vrot.lane.b32.xlu0 %v1607_v18, %s2333_s15  ;;  %1386 = vrot.lane.b32.xlu1 %v1366_v19, %s2330_s18 }
 0x4ef   : > { %1546 = vrot.lane.b32.xlu0 %v1526_v23, %s2332_s25  ;;  %1466 = vrot.lane.b32.xlu1 %v1446_v63, %s2331_s28 }
 0x4f3   : > { %1626 = vrot.lane.b32.xlu1 %v1606_v26, %s2333_s15  ;;  %1472 = vrot.lane.b32.xlu0 %v1449_v20, %s2331_s28 }
 0x4f7   : > { %1706 = vrot.lane.b32.xlu1 %v1686_v27, %s2334_s19  ;;  %1632 = vrot.lane.b32.xlu0 %v1609_v30, %s2333_s15 }
 0x4fb   : > { %1392 = vrot.lane.b32.xlu1 %v1369_v33, %s2330_s18  ;;  %1390 = vrot.lane.b32.xlu0 %v1368_v36, %s2330_s18 }
 0x4ff   : > { %1552 = vrot.lane.b32.xlu1 %v1529_v38, %s2332_s25  ;;  %1550 = vrot.lane.b32.xlu0 %v1528_v40, %s2332_s25 }
 0x503   : > { %1470 = vrot.lane.b32.xlu1 %v1448_v29, %s2331_s28  ;;  %1630 = vrot.lane.b32.xlu0 %v1608_v41, %s2333_s15 }
 0x507   : > { %1708 = vrot.lane.b32.xlu1 %v1687_v43, %s2334_s19  ;;  %1710 = vrot.lane.b32.xlu0 %v1688_v44, %s2334_s19 }
 0x50b   : > { %1712 = vrot.lane.b32.xlu1 %v1689_v35, %s2334_s19  ;;  %1284 = vperm.xlu0 %2229, %v2722_v22   ;;  %v1290_v22 = vpop.permute.xlu0 %1289 }
 0x50c   : > { %v1323_v58 = vmul.f32 %v2787_v47, %v1290_v22 }
 0x50f   : > { %1378 = vrot.lane.b32.xlu1 %v1362_v46, %s2330_s18  ;;  %1538 = vrot.lane.b32.xlu0 %v2794_v53, %s2332_s25  ;;  %v1300_v56 = vpop.permute.xlu0 %1299 }
 0x510   : > { %v1325_v8 = vmul.f32 %v2798_v54, %v1300_v56 }
 0x513   : > { %1458 = vrot.lane.b32.xlu1 %v1442_v39, %s2331_s28  ;;  %1698 = vrot.lane.b32.xlu0 %v1682_v50, %s2334_s19  ;;  %v1305_v57 = vpop.permute.xlu0 %1304 }
 0x514   : > { %v1326_v38 = vmul.f32 %v1305_v57, %v2808_v60  ;;  %v1329_v60 = vmul.f32 %v2815_v0, %v2891_v45 }
 0x517   : > { %1618 = vrot.lane.b32.xlu1 %v1602_v52, %s2333_s15 }
 0x539   : > { %v1461_v61 = vpop.permute.xlu0 %1460  ;;  %v1381_v53 = vpop.permute.xlu1 %1380 }
 0x53a   : > { %v1403_v62 = vadd.f32 %v1381_v53, %v1323_v58 }
 0x53c   : > { %v1483_v63 = vadd.f32 %v1461_v61, %v1403_v62  ;;  %v1328_v62 = vmul.f32 %v2882_v42, %v2817_v1  ;;  %v482_v1 = vld [vmem:[%s2988_s2] sm:$0xff] }
 0x53d   : > { %v1621_v31 = vpop.permute.xlu0 %1620  ;;  %v1541_v2 = vpop.permute.xlu1 %1540  ;;  %v1771_v42 = vld [vmem:[%s2992_s6] sm:$0xff] }
 0x53e   : > { %v1563_v3 = vadd.f32 %v1541_v2, %v1483_v63 }
 0x540   : > { %v1643_v4 = vadd.f32 %v1621_v31, %v1563_v3 }
 0x541   : > { %v1701_v5 = vpop.permute.xlu1 %1700  ;;  %v1465_v6 = vpop.permute.xlu0 %1464 }
 0x542   : > { %v1723_v7 = vadd.f32 %v1701_v5, %v1643_v4 }
 0x544   : > { %1731 = vrot.lane.b32.xlu1 %v1723_v7, %s3014_s27 }
 0x545   : > { %v1625_v9 = vpop.permute.xlu0 %1624  ;;  %v1385_v10 = vpop.permute.xlu1 %1384 }
 0x546   : > { %v1405_v11 = vadd.f32 %v1385_v10, %v1325_v8 }
 0x548   : > { %v1485_v12 = vadd.f32 %v1465_v6, %v1405_v11 }
 0x549   : > { %v1545_v47 = vpop.permute.xlu1 %1544  ;;  %v1383_v13 = vpop.permute.xlu0 %1382 }
 0x54a   : > { %v1565_v14 = vadd.f32 %v1545_v47, %v1485_v12  ;;  %v1404_v19 = vadd.f32 %v1383_v13, %v1324_v15 }
 0x54c   : > { %v1645_v16 = vadd.f32 %v1625_v9, %v1565_v14 }
 0x54d   : > { %v1705_v17 = vpop.permute.xlu1 %1704  ;;  %v1463_v18 = vpop.permute.xlu0 %1462 }
 0x54e   : > { %v1725_v21 = vadd.f32 %v1705_v17, %v1645_v16  ;;  %v1484_v23 = vadd.f32 %v1463_v18, %v1404_v19 }
 0x550   : > { %1739 = vrot.lane.b32.xlu1 %v1725_v21, %s2334_s19 }
 0x551   : > { %v1623_v25 = vpop.permute.xlu1 %1622  ;;  %v1543_v54 = vpop.permute.xlu0 %1542 }
 0x552   : > { %v1564_v26 = vadd.f32 %v1543_v54, %v1484_v23 }
 0x554   : > { %v1644_v20 = vadd.f32 %v1623_v25, %v1564_v26 }
 0x555   : > { %v1703_v27 = vpop.permute.xlu0 %1702  ;;  %v1389_v30 = vpop.permute.xlu1 %1388 }
 0x556   : > { %v1724_v32 = vadd.f32 %v1703_v27, %v1644_v20  ;;  %v1407_v56 = vadd.f32 %v1389_v30, %v1327_v51 }
 0x558   : > { %1735 = vrot.lane.b32.xlu0 %v1724_v32, %s3015_s21 }
 0x559   : > { %v1469_v33 = vpop.permute.xlu0 %1468  ;;  %v1549_v36 = vpop.permute.xlu1 %1548 }
 0x55a   : > { %v1487_v57 = vadd.f32 %v1469_v33, %v1407_v56 }
 0x55c   : > { %v1567_v63 = vadd.f32 %v1549_v36, %v1487_v57 }
 0x55d   : > { %v1629_v55 = vpop.permute.xlu0 %1628  ;;  %v1387_v24 = vpop.permute.xlu1 %1386 }
 0x55e   : > { %v1406_v40 = vadd.f32 %v1387_v24, %v1326_v38  ;;  %v1647_v4 = vadd.f32 %v1629_v55, %v1567_v63 }
 0x561   : > { %v1547_v28 = vpop.permute.xlu0 %1546  ;;  %v1467_v29 = vpop.permute.xlu1 %1466 }
 0x562   : > { %v1486_v41 = vadd.f32 %v1467_v29, %v1406_v40  ;;  %v1770_v29 = vld [vmem:[%s2991_s5] sm:$0xff] }
 0x564   : > { %v1566_v43 = vadd.f32 %v1547_v28, %v1486_v41 }
 0x565   : > { %v1627_v44 = vpop.permute.xlu1 %1626  ;;  %v1473_v35 = vpop.permute.xlu0 %1472 }
 0x566   : > { %v1646_v46 = vadd.f32 %v1627_v44, %v1566_v43 }
 0x569   : > { %v1707_v48 = vpop.permute.xlu1 %1706  ;;  %v1633_v39 = vpop.permute.xlu0 %1632 }
 0x56a   : > { %v1726_v50 = vadd.f32 %v1707_v48, %v1646_v46 }
 0x56c   : > { %1743 = vrot.lane.b32.xlu0 %v1726_v50, %s2333_s15 }
 0x56d   : > { %v1393_v52 = vpop.permute.xlu1 %1392  ;;  %v1391_v22 = vpop.permute.xlu0 %1390 }
 0x56e   : > { %v1409_v58 = vadd.f32 %v1393_v52, %v1329_v60  ;;  %v1408_v31 = vadd.f32 %v1391_v22, %v1328_v62 }
 0x570   : > { %v1489_v2 = vadd.f32 %v1473_v35, %v1409_v58 }
 0x571   : > { %v1553_v61 = vpop.permute.xlu1 %1552  ;;  %v1551_v53 = vpop.permute.xlu0 %1550 }
 0x572   : > { %v1569_v5 = vadd.f32 %v1553_v61, %v1489_v2 }
 0x574   : > { %v1649_v10 = vadd.f32 %v1633_v39, %v1569_v5 }
 0x575   : > { %v1471_v3 = vpop.permute.xlu1 %1470  ;;  %v1631_v59 = vpop.permute.xlu0 %1630 }
 0x576   : > { %v1488_v37 = vadd.f32 %v1471_v3, %v1408_v31 }
 0x578   : > { %v1568_v6 = vadd.f32 %v1551_v53, %v1488_v37 }
 0x579   : > { %v1709_v7 = vpop.permute.xlu1 %1708  ;;  %v1711_v0 = vpop.permute.xlu0 %1710 }
 0x57a   : > { %v1648_v8 = vadd.f32 %v1631_v59, %v1568_v6  ;;  %v1727_v9 = vadd.f32 %v1709_v7, %v1647_v4 }
 0x57c   : > { %v1728_v45 = vadd.f32 %v1711_v0, %v1648_v8  ;;  %1747 = vrot.lane.b32.xlu1 %v1727_v9, %s2332_s25  ;;  %s470_s25 = sand.u32 1, %s2315_s30  }
 0x57d   : > { %v1713_v11 = vpop.permute.xlu1 %1712  ;;  %s1947_s22 = sshll.u32 %s470_s25, 3  ;;  %s1857_s26 = scalar_lea.sflag [#allocation4], %s470_s25 }
 0x57e   : > { %v1729_v12 = vadd.f32 %v1713_v11, %v1649_v10  ;;  %1751 = vrot.lane.b32.xlu0 %v1728_v45, %s2331_s28  ;;  %s472_s27 = scalar_lea.vmem [#allocation6], %s1947_s22  ;;  %s2261_s28 = sshll.u32 %s2342_s17, 4  ;;  %s2262_s28 = int_to_ptr.vmem [resolvable:$false] %s2261_s28 }
 0x57f   : > { %s1870_s21 = sshll.u32 %s472_s27, 4  ;;  %s2263_s22 = scalar_lea.vmem %s2262_s28, 256  ;;  %s2946_s21 = int_to_ptr.vmem [resolvable:$true] %s1870_s21 }
 0x580   : > { %1755 = vrot.lane.b32.xlu1 %v1729_v12, %s2330_s18  ;;  %s2257_s18 = scalar_lea.vmem %s2946_s21, 128  ;;  %p2264_p13 = scmp.lt.s32.totalorder %s2946_s21, %s2262_s28 }
 0x581   : > { %v1379_v14 = vpop.permute.xlu1 %1378  ;;  %p2258_p10 = scmp.ne.s32.totalorder %s2946_s21, %s2257_s18  ;;  %p2265_p0 = scmp.lt.s32.totalorder %s2263_s22, %s2257_s18 }
 0x582   : > { %486 = vperm.xlu0 %2229, %v482_v1  }
 0x583   : > { %p2259_p11 = pnand %p2258_p10, %p2456_p5  ;;  %p2266_p1 = por %p2265_p0, %p2264_p13 }
 0x584   : > { %1774 = vperm.xlu1 %2231, %v1771_v42  }
 0x585   : > { %v1459_v16 = vpop.permute.xlu1 %1458  ;;  %p2260_p12 = pneg %p2259_p11 }
 0x587   : > { %p2267_p2 = pnand %p2266_p1, %p2260_p12 }
 0x589   : > { %v1619_v21 = vpop.permute.xlu1 %1618 }
 0x58a   : > { %v1285_v47 = vpop.permute.xlu0 %1284 }
 0x58b   : > { %v1322_v13 = vmul.f32 %v1285_v47, %v2789_v49 }
 0x58d   : > { %v1402_v15 = vadd.f32 %v1379_v14, %v1322_v13 }
 0x58e   : > { %v1539_v18 = vpop.permute.xlu0 %1538 }
 0x58f   : > { %v1482_v17 = vadd.f32 %v1459_v16, %v1402_v15 }
 0x591   : > { %v1562_v19 = vadd.f32 %v1539_v18, %v1482_v17 }
 0x592   : > { %v1699_v25 = vpop.permute.xlu0 %1698 }
 0x593   : > { %v1642_v23 = vadd.f32 %v1619_v21, %v1562_v19 }
 0x595   : > { %v1722_v26 = vadd.f32 %v1699_v25, %v1642_v23 }
 0x5b6   : > { %v1732_v54 = vpop.permute.xlu1 %1731 }
 0x5b7   : > { %v1758_v27 = vsel %vm773_vm3, %v1722_v26, %v1732_v54 }
 0x5c2   : > { %v1740_v30 = vpop.permute.xlu1 %1739 }
 0x5ca   : > { %v1736_v20 = vpop.permute.xlu0 %1735 }
 0x5cb   : > { %v1760_v32 = vsel %vm1759_vm10, %v1758_v27, %v1736_v20 }
 0x5cc   : > { %v1762_v33 = vsel %vm1761_vm11, %v1760_v32, %v1740_v30 }
 0x5de   : > { %v1744_v49 = vpop.permute.xlu0 %1743 }
 0x5df   : > { %v1764_v36 = vsel %vm1763_vm12, %v1762_v33, %v1744_v49 }
 0x5ee   : > { %v1748_v55 = vpop.permute.xlu1 %1747 }
 0x5ef   : > { %v1766_v24 = vsel %vm1765_vm13, %v1764_v36, %v1748_v55 }
 0x5f0   : > { %v1752_v38 = vpop.permute.xlu0 %1751 }
 0x5f1   : > { %v1767_v40 = vsel %vm976_vm9, %v1766_v24, %v1752_v38 }
 0x5f2   : > { %v1756_v28 = vpop.permute.xlu1 %1755 }
 0x5f3   : > { %v1769_v41 = vsel %vm1768_vm14, %v1767_v40, %v1756_v28 }
 0x5f4   : > { %2100 = vmatpush3.msk.msra.mxu1 %vm897_vm7, %v1769_v41 }
 0x5f5   : > { %2102 = vmatmul.mubr.msk.f32.vlgmr.msra.gmra.mrb[2].mxu1 %vm890_vm5, %v1770_v29 }
 0x601   : > { %v487_v43 = vpop.permute.xlu0 %486 }
 0x602   : > { %v572_v46 = vadd.f32 %v2571_v34, %v487_v43 }
 0x603   : > { %v1775_v44 = vpop.permute.xlu1 %1774 }
 0x6c8   : > { %v1849_v35 = vpop.f32.mrb[2].mxu1 }
 0x6c9   : > { %v1850_v48 = vadd.f32 %v1849_v35, %v1775_v44  ;;  %v2103_v39 = vpop.f32.mrb[3].mxu1 }
 0x6cb   : > { %v1853_v50 = vadd.f32 %v1850_v48, %v572_v46 }
 0x6cd   : > { %v1854_v51 = vmax.f32 %v1853_v50, 0.0 }
 0x6cf   : > { %1855 = vst [vmem:[%s472_s27] sm:$0xff] %v1854_v51 }
 0x6d0   : > { %2270 = shalt.err (!%p2267_p2)
}
 0x6d1   : > { %s2271_s25 = scalar_lea.hbm %s2944_s20, 128  ;;  %s2275_s15 = scalar_lea.hbm %s3000_s14, 256 }
 0x6d2   : > { %p2272_p3 = scmp.ne.s32.totalorder %s2944_s20, %s2271_s25  ;;  %p2276_p8 = scmp.lt.u32.totalorder %s2944_s20, %s3000_s14 }
 0x6d3   : > { %p2277_p9 = scmp.lt.u32.totalorder %s2275_s15, %s2271_s25  ;;  %p2279_p11 = scmp.lt.u32.totalorder %s2271_s25, %s2944_s20 }
 0x6d4   : > { %p2273_p4 = pnand %p2272_p3, %p2456_p5 }
 0x6d5   : > { %p2278_p10 = por %p2277_p9, %p2276_p8 }
 0x6d6   : > { %p2274_p7 = pneg %p2273_p4 }
 0x6d7   : > { %p2280_p12 = por %p2279_p11, %p2278_p10 }
 0x6d9   : > { %p2281_p13 = pnand %p2280_p12, %p2274_p7 }
 0x6db   : > { %2284 = shalt.err (!%p2281_p13)
}
 0x6dc   : > { %2139 = dma.vmem_to_hbm [thread:$0]  (%p2456_p5), %s2946_s21, 128, %s2944_s20, %s1857_s26  }
 0x6dd PF: > { %p2151_p0 = scmp.ge.s32.totalorder %s2323_s16, 2  ;;  %s1882_s18 = sand.u32 1, %s2311_s29  }
 0x6de   : > { %s1883_s28 = scalar_lea.sflag [#allocation4], %s1882_s18 }
 0x6df   : > { %p2146_p1 = pnand %p2151_p0, %p2460_p6 }
 0x6e1   : > { %2306 = dma.done.wait (!%p2146_p1), %s1883_s28, 128  }
 0x6e2   : > { %2308 = vsyncadd (!%p2146_p1), %s1883_s28, 4294967168  ;;  %s3016_s16 = sld [smem:[#allocation10_spill]]  ;;  %s3017_s22 = sld [smem:[#allocation9_spill]] }
 0x6e3   : > { %s3018_s15 = sld [smem:[#allocation11_spill]]  ;;  %s3019_s29 = smov %s2315_s30 }
 0x6e8   : > { %p25_p2 = scmp.ge.s32.totalorder %s3016_s16, 4   ;;  %s3020_s30 = smov %s3017_s22 }
 0x6ea   :  { %27 = sbr.rel (!%p25_p2) target bundleno = 6 (0x6), region = 116 }
 0x6f1   :  { %1888 = vsyncpa [#allocation4], 1 }
 0x6f2   :  { %1890 = vsyncpa [#allocation4 + $0x1], 1 }
 0x6f3   :  { %1891 = vsyncpa [#allocation5], 1 }
 0x6f4   :  { %1893 = vsyncpa [#allocation5 + $0x1], 1 }

</bundles_post_ra>
